<compile_context>
chip_gen: v7x
topology: tpu7x:2x2x1
jax: 0.10.0
libtpu: 0.0.40
codegen_flags: <defaults>
</compile_context>

<pallas_src>
import functools

import jax
import jax.numpy as jnp
from jax import lax
from jax.experimental import pallas as pl
from jax.experimental.pallas import tpu as pltpu

EPS = 1e-5
COMPUTE_DTYPE = jnp.bfloat16          # MXU operand dtype (f32 accumulation)
_MIB = 1024 * 1024


def _layernorm(t, gamma, beta):
    mu = jnp.mean(t, axis=-1, keepdims=True)
    var = jnp.mean((t - mu) * (t - mu), axis=-1, keepdims=True)
    return (t - mu) * lax.rsqrt(var + EPS) * gamma + beta


def _round_up(x, m):
    return ((x + m - 1) // m) * m


def _vmem_budget():
    """(vmem_limit_bytes, physical_capacity): per-generation, with headroom."""
    cap = None
    try:
        cap = getattr(pltpu.get_tpu_info(), "vmem_capacity_bytes", None)
    except Exception:
        cap = None
    if not cap:
        cap = 64 * _MIB            # conservative fallback: assume v7x (64 MiB)
    return int(cap * 0.8), int(cap)


# ---------------------------------------------------------------------------
# Kernel A: per-batch, layer-invariant fold of the whole attention chain.
#   W_attn = Wq @ (K^T V / Skb) @ Wo, with K^T V accumulated over Skb tiles.
# ---------------------------------------------------------------------------
def _wattn_kernel(kb_ref, wk_ref, wv_ref,
                  lnkg_ref, lnkb_ref, lnvg_ref, lnvb_ref,
                  wq_ref, wo_ref,
                  wattn_ref, acc_ref, *, inv_skb):
    cd = COMPUTE_DTYPE
    f32 = jnp.float32
    k_idx = pl.program_id(1)

    @pl.when(k_idx == 0)
    def _():
        acc_ref[...] = jnp.zeros_like(acc_ref)

    kb = kb_ref[0].astype(cd)                                     # (tskb, D)
    k = _layernorm(jnp.dot(kb, wk_ref[...], preferred_element_type=f32),
                   lnkg_ref[...], lnkb_ref[...])                  # f32 stats
    v = _layernorm(jnp.dot(kb, wv_ref[...], preferred_element_type=f32),
                   lnvg_ref[...], lnvb_ref[...])
    # K^T V over this Skb tile (contract the kb-sequence axis), f32 accumulate.
    acc_ref[...] += lax.dot_general(k.astype(cd), v.astype(cd),
                                    (((0,), (0,)), ((), ())),
                                    preferred_element_type=f32)

    @pl.when(k_idx == pl.num_programs(1) - 1)
    def _():
        ktv = (acc_ref[...] * inv_skb).astype(cd)                 # (D, D)
        tmp = jnp.dot(wq_ref[...], ktv, preferred_element_type=f32)
        wattn = jnp.dot(tmp.astype(cd), wo_ref[...],
                        preferred_element_type=f32)
        wattn_ref[0] = wattn.astype(wattn_ref.dtype)


# ---------------------------------------------------------------------------
# Kernel B: the full N-layer decoder stack, fused, per (batch, q-tile).
# ---------------------------------------------------------------------------
def _decoder_stack_kernel(x_ref, nxt_ref, wattn_ref,
                          wn_ref, w1_ref, b1_ref, w2_ref, b2_ref,
                          out_ref, *, n_layers):
    cd = COMPUTE_DTYPE
    f32 = jnp.float32

    x0 = x_ref[0].astype(f32)            # (tsq, D)  residual path stays f32
    wattn = wattn_ref[0]                 # (D, D)    bf16, pre-folded & scaled

    # layer-invariant term, hoisted out of the layer loop
    nxt_proj = jnp.dot(nxt_ref[0].astype(cd), wn_ref[...],
                       preferred_element_type=f32)                # (tsq, D)
    w1 = w1_ref[...]
    w2 = w2_ref[...]
    b1 = b1_ref[...]                     # (1, H) f32 — rank-broadcast add
    b2 = b2_ref[...]                     # (1, D) f32 — rank-broadcast add

    def layer(_, x):
        # Galerkin cross attention, fully folded into one matmul.
        x = x + jnp.dot(x.astype(cd), wattn, preferred_element_type=f32) \
              + nxt_proj
        # position-wise feed-forward with residual
        h = jnp.maximum(
            jnp.dot(x.astype(cd), w1, preferred_element_type=f32) + b1, 0.0)
        return x + jnp.dot(h.astype(cd), w2, preferred_element_type=f32) + b2

    x = lax.fori_loop(0, n_layers, layer, x0, unroll=(n_layers <= 12))
    out_ref[0] = x.astype(out_ref.dtype)


# ---------------------------------------------------------------------------
# Tiling helpers
# ---------------------------------------------------------------------------
def _pick_kb_tile(skb, max_tile):
    """Skb tile: prefer multiples of 128 (aligned K^T contraction), else 8."""
    if skb <= max_tile:
        return skb
    t = max_tile - (max_tile % 128)
    while t >= 128:
        if skb % t == 0:
            return t
        t -= 128
    t = max_tile - (max_tile % 8)
    while t >= 8:
        if skb % t == 0:
            return t
        t -= 8
    return skb


def _pick_sq_tiling(sq, max_tile, batch, min_programs=2):
    """Return (tsq, sq_padded). Pads Sq instead of blowing the VMEM budget,
    and shrinks tsq so both v7x TensorCores get at least one program."""
    sq8 = _round_up(sq, 8)
    tsq = min(_round_up(max_tile, 8), sq8)
    while batch * pl.cdiv(sq8, tsq) < min_programs and tsq > 8:
        tsq = max(8, _round_up(tsq // 2, 8))
    sq_padded = _round_up(sq8, tsq)
    return tsq, sq_padded


# ---------------------------------------------------------------------------
# Wrapper
# ---------------------------------------------------------------------------
def _galerkin_decoder_impl(x, kb, nxt, params, n_layers):
    B, Sq, D = x.shape
    _, Skb, _ = kb.shape
    H = params["w1"].shape[1]
    cd = COMPUTE_DTYPE

    vmem_limit, vmem_cap = _vmem_budget()
    big_vmem = vmem_cap > 64 * _MIB          # v5e/v6e (128 MiB) vs v7x (64 MiB)
    max_sq_tile = 1024 if big_vmem else 512
    max_kb_tile = 1024 if big_vmem else 512

    # Weights in bf16 for the MXU (halves HBM/VMEM bytes); biases and
    # layernorm affine params stay f32.
    # TODO(synk): kb/nxt could be passed bf16 if the upstream producer already
    # emits bf16 (the cast must fuse upstream to actually save DMA bytes).
    wq = params["wq"].astype(cd)
    wk = params["wk"].astype(cd)
    wv = params["wv"].astype(cd)
    wo = params["wo"].astype(cd)
    wn = params["wn"].astype(cd)
    w1 = params["w1"].astype(cd)
    w2 = params["w2"].astype(cd)

    # ---- Kernel A: W_attn = Wq (LN(kb Wk)^T LN(kb Wv) / Skb) Wo per batch --
    tskb = _pick_kb_tile(Skb, max_kb_tile)
    nkb = Skb // tskb
    const_a = lambda shape: pl.BlockSpec(               # constant-index weights:
        shape, lambda b, k: (0,) * len(shape),          # single-buffered
        pipeline_mode=pl.Buffered(1))
    wattn = pl.pallas_call(
        functools.partial(_wattn_kernel, inv_skb=1.0 / Skb),
        out_shape=jax.ShapeDtypeStruct((B, D, D), cd),
        grid_spec=pltpu.PrefetchScalarGridSpec(
            num_scalar_prefetch=0,
            grid=(B, nkb),
            in_specs=[
                pl.BlockSpec((1, tskb, D), lambda b, k: (b, k, 0)),   # kb
                const_a((D, D)),  # wk
                const_a((D, D)),  # wv
                const_a((1, D)),  # ln_k gamma
                const_a((1, D)),  # ln_k beta
                const_a((1, D)),  # ln_v gamma
                const_a((1, D)),  # ln_v beta
                const_a((D, D)),  # wq
                const_a((D, D)),  # wo
            ],
            out_specs=pl.BlockSpec((1, D, D), lambda b, k: (b, 0, 0)),
            scratch_shapes=[pltpu.VMEM((D, D), jnp.float32)]),
        compiler_params=pltpu.CompilerParams(
            dimension_semantics=("parallel", "arbitrary"),
            vmem_limit_bytes=vmem_limit),
    )(kb, wk, wv,
      params["lnk_g"], params["lnk_b"], params["lnv_g"], params["lnv_b"],
      wq, wo)

    # ---- Kernel B: fused N-layer stack over (batch, Sq-tile) --------------
    tsq, sq_padded = _pick_sq_tiling(Sq, max_sq_tile, B)
    if sq_padded != Sq:
        pad = sq_padded - Sq
        x_in = jnp.pad(x, ((0, 0), (0, pad), (0, 0)))
        nxt_in = jnp.pad(nxt, ((0, 0), (0, pad), (0, 0)))
    else:
        x_in, nxt_in = x, nxt
    nsq = sq_padded // tsq

    const_b = lambda shape: pl.BlockSpec(
        shape, lambda b, s: (0,) * len(shape), pipeline_mode=pl.Buffered(1))
    flops = 2 * B * sq_padded * (D * D + n_layers * (D * D + 2 * D * H))
    bytes_accessed = (
        x_in.size * 4 + nxt_in.size * 4 + B * D * D * 2
        + (wn.size + w1.size + w2.size) * 2
        + (params["b1"].size + params["b2"].size) * 4
        + B * sq_padded * D * 4)

    # TODO(synk): add input_output_aliases={0: 0} when x is dead after this
    # call (it is reused by the reference check in this script).
    out = pl.pallas_call(
        functools.partial(_decoder_stack_kernel, n_layers=n_layers),
        out_shape=jax.ShapeDtypeStruct((B, sq_padded, D), x.dtype),
        grid_spec=pltpu.PrefetchScalarGridSpec(
            num_scalar_prefetch=0,
            grid=(B, nsq),
            in_specs=[
                pl.BlockSpec((1, tsq, D), lambda b, s: (b, s, 0)),   # x
                pl.BlockSpec((1, tsq, D), lambda b, s: (b, s, 0)),   # nxt
                pl.BlockSpec((1, D, D), lambda b, s: (b, 0, 0)),     # W_attn
                const_b((D, D)),  # wn
                const_b((D, H)),  # w1
                const_b((1, H)),  # b1
                const_b((H, D)),  # w2
                const_b((1, D)),  # b2
            ],
            out_specs=pl.BlockSpec((1, tsq, D), lambda b, s: (b, s, 0)),
        ),
        compiler_params=pltpu.CompilerParams(
            dimension_semantics=("parallel", "parallel"),
            vmem_limit_bytes=vmem_limit),
        cost_estimate=pl.CostEstimate(
            flops=int(flops), transcendentals=0,
            bytes_accessed=int(bytes_accessed)),
    )(x_in, nxt_in, wattn, wn, w1, params["b1"], w2, params["b2"])

    if sq_padded != Sq:
        out = out[:, :Sq, :]
    return out


galerkin_decoder = jax.jit(_galerkin_decoder_impl, static_argnames=("n_layers",))


# ---------------------------------------------------------------------------
# pure-JAX references
# ---------------------------------------------------------------------------
def _ref_decoder_folded(x, kb, nxt, p, n_layers):
    """Mirrors the kernel math exactly (W_attn fold, bf16 MXU operands)."""
    cd = COMPUTE_DTYPE
    f32 = jnp.float32
    skb = kb.shape[1]
    k = _layernorm(jnp.einsum("bkd,de->bke", kb.astype(cd), p["wk"].astype(cd),
                              preferred_element_type=f32),
                   p["lnk_g"], p["lnk_b"])
    v = _layernorm(jnp.einsum("bkd,de->bke", kb.astype(cd), p["wv"].astype(cd),
                              preferred_element_type=f32),
                   p["lnv_g"], p["lnv_b"])
    ktv = (jnp.einsum("bkd,bke->bde", k.astype(cd), v.astype(cd),
                      preferred_element_type=f32) / skb).astype(cd)
    tmp = jnp.einsum("de,bef->bdf", p["wq"].astype(cd), ktv,
                     preferred_element_type=f32)
    wattn = jnp.einsum("bdf,fg->bdg", tmp.astype(cd), p["wo"].astype(cd),
                       preferred_element_type=f32).astype(cd)
    nxt_proj = jnp.einsum("bqd,de->bqe", nxt.astype(cd), p["wn"].astype(cd),
                          preferred_element_type=f32)
    x = x.astype(f32)
    for _ in range(n_layers):
        x = x + jnp.einsum("bqd,bde->bqe", x.astype(cd), wattn,
                           preferred_element_type=f32) + nxt_proj
        h = jnp.maximum(
            jnp.einsum("bqd,dh->bqh", x.astype(cd), p["w1"].astype(cd),
                       preferred_element_type=f32) + p["b1"], 0.0)
        x = x + jnp.einsum("bqh,hd->bqd", h.astype(cd), p["w2"].astype(cd),
                           preferred_element_type=f32) + p["b2"]
    return x


def _ref_decoder_f32(x, kb, nxt, p, n_layers):
    """Original (unfolded) layer math entirely in f32 — checks that the
    W_attn algebraic fold preserves the forward-pass semantics."""
    skb = kb.shape[1]
    k = _layernorm(jnp.einsum("bkd,de->bke", kb, p["wk"]),
                   p["lnk_g"], p["lnk_b"])
    v = _layernorm(jnp.einsum("bkd,de->bke", kb, p["wv"]),
                   p["lnv_g"], p["lnv_b"])
    ktv = jnp.einsum("bkd,bke->bde", k, v) / skb
    nxt_proj = jnp.einsum("bqd,de->bqe", nxt, p["wn"])
    for _ in range(n_layers):
        q = jnp.einsum("bqd,de->bqe", x, p["wq"])
        attn = jnp.einsum("bqd,bde->bqe", q, ktv)
        x = x + jnp.einsum("bqd,de->bqe", attn, p["wo"]) + nxt_proj
        h = jnp.maximum(jnp.einsum("bqd,dh->bqh", x, p["w1"]) + p["b1"], 0.0)
        x = x + jnp.einsum("bqh,hd->bqd", h, p["w2"]) + p["b2"]
    return x


def init_params(key, d_model, d_hidden):
    ks = jax.random.split(key, 7)
    scale = 1.0 / jnp.sqrt(d_model)
    hscale = 1.0 / jnp.sqrt(d_hidden)
    return {
        "wq": jax.random.normal(ks[0], (d_model, d_model), jnp.float32) * scale,
        "wk": jax.random.normal(ks[1], (d_model, d_model), jnp.float32) * scale,
        "wv": jax.random.normal(ks[2], (d_model, d_model), jnp.float32) * scale,
        "wo": jax.random.normal(ks[3], (d_model, d_model), jnp.float32) * scale,
        "wn": jax.random.normal(ks[4], (d_model, d_model), jnp.float32) * scale,
        "lnk_g": jnp.ones((1, d_model), jnp.float32),
        "lnk_b": jnp.zeros((1, d_model), jnp.float32),
        "lnv_g": jnp.ones((1, d_model), jnp.float32),
        "lnv_b": jnp.zeros((1, d_model), jnp.float32),
        "w1": jax.random.normal(ks[5], (d_model, d_hidden), jnp.float32) * scale,
        "b1": jnp.zeros((1, d_hidden), jnp.float32),
        "w2": jax.random.normal(ks[6], (d_hidden, d_model), jnp.float32) * hscale,
        "b2": jnp.zeros((1, d_model), jnp.float32),
    }


if __name__ == "__main__":
    # Small but lane-dense shapes (D, H multiples of 128; Sq, Skb multiples of 8).
    B, Sq, Skb, D, H = 2, 16, 32, 128, 256
    N_LAYERS = 3

    key = jax.random.PRNGKey(0)
    kx, kk, kn, kp = jax.random.split(key, 4)
    x = jax.random.normal(kx, (B, Sq, D), jnp.float32)
    kb = jax.random.normal(kk, (B, Skb, D), jnp.float32)
    nxt = jax.random.normal(kn, (B, Sq, D), jnp.float32)
    params = init_params(kp, D, H)

    out = galerkin_decoder(x, kb, nxt, params, N_LAYERS)
    out = jax.block_until_ready(out)
    assert out.shape == (B, Sq, D)

    # Exact-math mirror of the kernel (same fold, same bf16 cast points).
    ref = _ref_decoder_folded(x, kb, nxt, params, N_LAYERS)
    assert jnp.allclose(out, ref, rtol=1e-2, atol=1e-2), (
        float(jnp.max(jnp.abs(out - ref))))

    # Sanity check vs the original unfolded f32 math (fold is algebraically
    # exact; residual differences are bf16-operand rounding only).
    ref32 = _ref_decoder_f32(x, kb, nxt, params, N_LAYERS)
    rel = float(jnp.linalg.norm(out - ref32) / jnp.linalg.norm(ref32))
    assert rel < 3e-2, rel

    print("KERNEL_OK")
</pallas_src>

<mosaic_0001>
module attributes {stable_mosaic.version = 11 : i64} {
  func.func @_wattn_kernel(%arg0: i32, %arg1: i32, %arg2: memref<1x32x128xf32, #tpu.memory_space<vmem>>, %arg3: memref<128x128xbf16, #tpu.memory_space<vmem>>, %arg4: memref<128x128xbf16, #tpu.memory_space<vmem>>, %arg5: memref<1x128xf32, #tpu.memory_space<vmem>>, %arg6: memref<1x128xf32, #tpu.memory_space<vmem>>, %arg7: memref<1x128xf32, #tpu.memory_space<vmem>>, %arg8: memref<1x128xf32, #tpu.memory_space<vmem>>, %arg9: memref<128x128xbf16, #tpu.memory_space<vmem>>, %arg10: memref<128x128xbf16, #tpu.memory_space<vmem>>, %arg11: memref<1x128x128xbf16, #tpu.memory_space<vmem>>, %arg12: memref<128x128xf32, #tpu.memory_space<vmem>>) attributes {dimension_semantics = [#tpu.dimension_semantics<parallel>, #tpu.dimension_semantics<arbitrary>], iteration_bounds = array<i64: 2, 1>, scalar_prefetch = 0 : i64, scratch_operands = 1 : i64, tpu.core_type = #tpu.core_type<tc>, window_params = [{transform_indices = @transform_0, window_bounds = array<i64: 1, 32, 128>}, {pipeline_mode = #tpu.pipeline_mode<synchronous>, transform_indices = @transform_1, window_bounds = array<i64: 128, 128>}, {pipeline_mode = #tpu.pipeline_mode<synchronous>, transform_indices = @transform_2, window_bounds = array<i64: 128, 128>}, {pipeline_mode = #tpu.pipeline_mode<synchronous>, transform_indices = @transform_3, window_bounds = array<i64: 1, 128>}, {pipeline_mode = #tpu.pipeline_mode<synchronous>, transform_indices = @transform_4, window_bounds = array<i64: 1, 128>}, {pipeline_mode = #tpu.pipeline_mode<synchronous>, transform_indices = @transform_5, window_bounds = array<i64: 1, 128>}, {pipeline_mode = #tpu.pipeline_mode<synchronous>, transform_indices = @transform_6, window_bounds = array<i64: 1, 128>}, {pipeline_mode = #tpu.pipeline_mode<synchronous>, transform_indices = @transform_7, window_bounds = array<i64: 128, 128>}, {pipeline_mode = #tpu.pipeline_mode<synchronous>, transform_indices = @transform_8, window_bounds = array<i64: 128, 128>}, {transform_indices = @transform_9, window_bounds = array<i64: 1, 128, 128>}]} {
    %c0_i32 = arith.constant 0 : i32
    %0 = arith.cmpi eq, %arg1, %c0_i32 : i32
    %1 = arith.extui %0 : i1 to i32
    %c0_i32_0 = arith.constant 0 : i32
    %2 = arith.cmpi ne, %1, %c0_i32_0 : i32
    scf.if %2 {
      %cst_33 = arith.constant 0.000000e+00 : f32
      %71 = vector.broadcast %cst_33 : f32 to vector<128x128xf32>
      %c0_34 = arith.constant 0 : index
      %c0_35 = arith.constant 0 : index
      %72 = vector.load %arg12[%c0_34, %c0_35] : memref<128x128xf32, #tpu.memory_space<vmem>>, vector<128x128xf32>
      tpu.vector_store %arg12[%c0_34, %c0_35], %71 {strides = array<i32>} : memref<128x128xf32, #tpu.memory_space<vmem>>, vector<128x128xf32>,
    } else {
    }
    %c0 = arith.constant 0 : index
    %c0_1 = arith.constant 0 : index
    %c0_2 = arith.constant 0 : index
    %3 = vector.load %arg2[%c0, %c0_1, %c0_2] : memref<1x32x128xf32, #tpu.memory_space<vmem>>, vector<1x32x128xf32>
    %4 = vector.shape_cast %3 : vector<1x32x128xf32> to vector<32x128xf32>
    %5 = arith.truncf %4 : vector<32x128xf32> to vector<32x128xbf16>
    %c0_3 = arith.constant 0 : index
    %c0_4 = arith.constant 0 : index
    %6 = vector.load %arg3[%c0_3, %c0_4] : memref<128x128xbf16, #tpu.memory_space<vmem>>, vector<128x128xbf16>
    %cst = arith.constant dense<0.000000e+00> : vector<32x128xf32>
    %7 = tpu.matmul %5, %6, %cst {dimension_numbers = #tpu.dot_dimension_numbers<[1], [0], [0], [1], [0, 0, 1, 1], [], []>} : vector<32x128xbf16>, vector<128x128xbf16>, vector<32x128xf32> -> vector<32x128xf32>
    %c0_5 = arith.constant 0 : index
    %c0_6 = arith.constant 0 : index
    %8 = vector.load %arg5[%c0_5, %c0_6] : memref<1x128xf32, #tpu.memory_space<vmem>>, vector<1x128xf32>
    %c0_7 = arith.constant 0 : index
    %c0_8 = arith.constant 0 : index
    %9 = vector.load %arg6[%c0_7, %c0_8] : memref<1x128xf32, #tpu.memory_space<vmem>>, vector<1x128xf32>
    %cst_9 = arith.constant dense<0.000000e+00> : vector<32xf32>
    %10 = vector.multi_reduction <add>, %7, %cst_9 [1] : vector<32x128xf32> to vector<32xf32>
    %11 = vector.shape_cast %10 : vector<32xf32> to vector<32x1xf32>
    %cst_10 = arith.constant 1.280000e+02 : f32
    %12 = vector.broadcast %cst_10 : f32 to vector<32x1xf32>
    %13 = arith.divf %11, %12 : vector<32x1xf32>
    %14 = vector.broadcast %13 : vector<32x1xf32> to vector<32x128xf32>
    %15 = arith.subf %7, %14 : vector<32x128xf32>
    %16 = vector.broadcast %13 : vector<32x1xf32> to vector<32x128xf32>
    %17 = arith.subf %7, %16 : vector<32x128xf32>
    %18 = arith.mulf %15, %17 : vector<32x128xf32>
    %cst_11 = arith.constant dense<0.000000e+00> : vector<32xf32>
    %19 = vector.multi_reduction <add>, %18, %cst_11 [1] : vector<32x128xf32> to vector<32xf32>
    %20 = vector.shape_cast %19 : vector<32xf32> to vector<32x1xf32>
    %cst_12 = arith.constant 1.280000e+02 : f32
    %21 = vector.broadcast %cst_12 : f32 to vector<32x1xf32>
    %22 = arith.divf %20, %21 : vector<32x1xf32>
    %23 = vector.broadcast %13 : vector<32x1xf32> to vector<32x128xf32>
    %24 = arith.subf %7, %23 : vector<32x128xf32>
    %cst_13 = arith.constant 9.99999974E-6 : f32
    %25 = vector.broadcast %cst_13 : f32 to vector<32x1xf32>
    %26 = arith.addf %22, %25 : vector<32x1xf32>
    %27 = math.rsqrt %26 : vector<32x1xf32>
    %28 = vector.broadcast %27 : vector<32x1xf32> to vector<32x128xf32>
    %29 = arith.mulf %24, %28 : vector<32x128xf32>
    %30 = vector.broadcast %8 : vector<1x128xf32> to vector<32x128xf32>
    %31 = arith.mulf %29, %30 : vector<32x128xf32>
    %32 = vector.broadcast %9 : vector<1x128xf32> to vector<32x128xf32>
    %33 = arith.addf %31, %32 : vector<32x128xf32>
    %c0_14 = arith.constant 0 : index
    %c0_15 = arith.constant 0 : index
    %34 = vector.load %arg4[%c0_14, %c0_15] : memref<128x128xbf16, #tpu.memory_space<vmem>>, vector<128x128xbf16>
    %cst_16 = arith.constant dense<0.000000e+00> : vector<32x128xf32>
    %35 = tpu.matmul %5, %34, %cst_16 {dimension_numbers = #tpu.dot_dimension_numbers<[1], [0], [0], [1], [0, 0, 1, 1], [], []>} : vector<32x128xbf16>, vector<128x128xbf16>, vector<32x128xf32> -> vector<32x128xf32>
    %c0_17 = arith.constant 0 : index
    %c0_18 = arith.constant 0 : index
    %36 = vector.load %arg7[%c0_17, %c0_18] : memref<1x128xf32, #tpu.memory_space<vmem>>, vector<1x128xf32>
    %c0_19 = arith.constant 0 : index
    %c0_20 = arith.constant 0 : index
    %37 = vector.load %arg8[%c0_19, %c0_20] : memref<1x128xf32, #tpu.memory_space<vmem>>, vector<1x128xf32>
    %cst_21 = arith.constant dense<0.000000e+00> : vector<32xf32>
    %38 = vector.multi_reduction <add>, %35, %cst_21 [1] : vector<32x128xf32> to vector<32xf32>
    %39 = vector.shape_cast %38 : vector<32xf32> to vector<32x1xf32>
    %cst_22 = arith.constant 1.280000e+02 : f32
    %40 = vector.broadcast %cst_22 : f32 to vector<32x1xf32>
    %41 = arith.divf %39, %40 : vector<32x1xf32>
    %42 = vector.broadcast %41 : vector<32x1xf32> to vector<32x128xf32>
    %43 = arith.subf %35, %42 : vector<32x128xf32>
    %44 = vector.broadcast %41 : vector<32x1xf32> to vector<32x128xf32>
    %45 = arith.subf %35, %44 : vector<32x128xf32>
    %46 = arith.mulf %43, %45 : vector<32x128xf32>
    %cst_23 = arith.constant dense<0.000000e+00> : vector<32xf32>
    %47 = vector.multi_reduction <add>, %46, %cst_23 [1] : vector<32x128xf32> to vector<32xf32>
    %48 = vector.shape_cast %47 : vector<32xf32> to vector<32x1xf32>
    %cst_24 = arith.constant 1.280000e+02 : f32
    %49 = vector.broadcast %cst_24 : f32 to vector<32x1xf32>
    %50 = arith.divf %48, %49 : vector<32x1xf32>
    %51 = vector.broadcast %41 : vector<32x1xf32> to vector<32x128xf32>
    %52 = arith.subf %35, %51 : vector<32x128xf32>
    %cst_25 = arith.constant 9.99999974E-6 : f32
    %53 = vector.broadcast %cst_25 : f32 to vector<32x1xf32>
    %54 = arith.addf %50, %53 : vector<32x1xf32>
    %55 = math.rsqrt %54 : vector<32x1xf32>
    %56 = vector.broadcast %55 : vector<32x1xf32> to vector<32x128xf32>
    %57 = arith.mulf %52, %56 : vector<32x128xf32>
    %58 = vector.broadcast %36 : vector<1x128xf32> to vector<32x128xf32>
    %59 = arith.mulf %57, %58 : vector<32x128xf32>
    %60 = vector.broadcast %37 : vector<1x128xf32> to vector<32x128xf32>
    %61 = arith.addf %59, %60 : vector<32x128xf32>
    %c0_26 = arith.constant 0 : index
    %c0_27 = arith.constant 0 : index
    %62 = vector.load %arg12[%c0_26, %c0_27] : memref<128x128xf32, #tpu.memory_space<vmem>>, vector<128x128xf32>
    %63 = arith.truncf %33 : vector<32x128xf32> to vector<32x128xbf16>
    %64 = arith.truncf %61 : vector<32x128xf32> to vector<32x128xbf16>
    %cst_28 = arith.constant dense<0.000000e+00> : vector<128x128xf32>
    %65 = tpu.matmul %63, %64, %cst_28 {dimension_numbers = #tpu.dot_dimension_numbers<[0], [0], [1], [1], [0, 1, 1, 1], [], []>} : vector<32x128xbf16>, vector<32x128xbf16>, vector<128x128xf32> -> vector<128x128xf32>
    %66 = arith.addf %62, %65 : vector<128x128xf32>
    %c0_29 = arith.constant 0 : index
    %c0_30 = arith.constant 0 : index
    %67 = vector.load %arg12[%c0_29, %c0_30] : memref<128x128xf32, #tpu.memory_space<vmem>>, vector<128x128xf32>
    tpu.vector_store %arg12[%c0_29, %c0_30], %66 {strides = array<i32>} : memref<128x128xf32, #tpu.memory_space<vmem>>, vector<128x128xf32>,
    %c0_i32_31 = arith.constant 0 : i32
    %68 = arith.cmpi eq, %arg1, %c0_i32_31 : i32
    %69 = arith.extui %68 : i1 to i32
    %c0_i32_32 = arith.constant 0 : i32
    %70 = arith.cmpi ne, %69, %c0_i32_32 : i32
    scf.if %70 {
      %c0_33 = arith.constant 0 : index
      %c0_34 = arith.constant 0 : index
      %71 = vector.load %arg12[%c0_33, %c0_34] : memref<128x128xf32, #tpu.memory_space<vmem>>, vector<128x128xf32>
      %cst_35 = arith.constant 3.125000e-02 : f32
      %72 = vector.broadcast %cst_35 : f32 to vector<128x128xf32>
      %73 = arith.mulf %71, %72 : vector<128x128xf32>
      %74 = arith.truncf %73 : vector<128x128xf32> to vector<128x128xbf16>
      %c0_36 = arith.constant 0 : index
      %c0_37 = arith.constant 0 : index
      %75 = vector.load %arg9[%c0_36, %c0_37] : memref<128x128xbf16, #tpu.memory_space<vmem>>, vector<128x128xbf16>
      %cst_38 = arith.constant dense<0.000000e+00> : vector<128x128xf32>
      %76 = tpu.matmul %75, %74, %cst_38 {dimension_numbers = #tpu.dot_dimension_numbers<[1], [0], [0], [1], [0, 0, 1, 1], [], []>} : vector<128x128xbf16>, vector<128x128xbf16>, vector<128x128xf32> -> vector<128x128xf32>
      %77 = arith.truncf %76 : vector<128x128xf32> to vector<128x128xbf16>
      %c0_39 = arith.constant 0 : index
      %c0_40 = arith.constant 0 : index
      %78 = vector.load %arg10[%c0_39, %c0_40] : memref<128x128xbf16, #tpu.memory_space<vmem>>, vector<128x128xbf16>
      %cst_41 = arith.constant dense<0.000000e+00> : vector<128x128xf32>
      %79 = tpu.matmul %77, %78, %cst_41 {dimension_numbers = #tpu.dot_dimension_numbers<[1], [0], [0], [1], [0, 0, 1, 1], [], []>} : vector<128x128xbf16>, vector<128x128xbf16>, vector<128x128xf32> -> vector<128x128xf32>
      %80 = arith.truncf %79 : vector<128x128xf32> to vector<128x128xbf16>
      %c0_42 = arith.constant 0 : index
      %c0_43 = arith.constant 0 : index
      %c0_44 = arith.constant 0 : index
      %81 = vector.load %arg11[%c0_42, %c0_43, %c0_44] : memref<1x128x128xbf16, #tpu.memory_space<vmem>>, vector<1x128x128xbf16>
      %82 = vector.shape_cast %81 : vector<1x128x128xbf16> to vector<128x128xbf16>
      %83 = vector.shape_cast %80 : vector<128x128xbf16> to vector<1x128x128xbf16>
      tpu.vector_store %arg11[%c0_42, %c0_43, %c0_44], %83 {strides = array<i32>} : memref<1x128x128xbf16, #tpu.memory_space<vmem>>, vector<1x128x128xbf16>,
    } else {
    }
    return
  }
  func.func @transform_0(%arg0: i32, %arg1: i32) -> (i32, i32, i32) {
    %c0_i32 = arith.constant 0 : i32
    %c0_i32_0 = arith.constant 0 : i32
    return %arg0, %arg1, %c0_i32 : i32, i32, i32
  }
  func.func @transform_1(%arg0: i32, %arg1: i32) -> (i32, i32) {
    %c0_i32 = arith.constant 0 : i32
    %c0_i32_0 = arith.constant 0 : i32
    %c0_i32_1 = arith.constant 0 : i32
    return %c0_i32, %c0_i32_0 : i32, i32
  }
  func.func @transform_2(%arg0: i32, %arg1: i32) -> (i32, i32) {
    %c0_i32 = arith.constant 0 : i32
    %c0_i32_0 = arith.constant 0 : i32
    %c0_i32_1 = arith.constant 0 : i32
    return %c0_i32, %c0_i32_0 : i32, i32
  }
  func.func @transform_3(%arg0: i32, %arg1: i32) -> (i32, i32) {
    %c0_i32 = arith.constant 0 : i32
    %c0_i32_0 = arith.constant 0 : i32
    %c0_i32_1 = arith.constant 0 : i32
    return %c0_i32, %c0_i32_0 : i32, i32
  }
  func.func @transform_4(%arg0: i32, %arg1: i32) -> (i32, i32) {
    %c0_i32 = arith.constant 0 : i32
    %c0_i32_0 = arith.constant 0 : i32
    %c0_i32_1 = arith.constant 0 : i32
    return %c0_i32, %c0_i32_0 : i32, i32
  }
  func.func @transform_5(%arg0: i32, %arg1: i32) -> (i32, i32) {
    %c0_i32 = arith.constant 0 : i32
    %c0_i32_0 = arith.constant 0 : i32
    %c0_i32_1 = arith.constant 0 : i32
    return %c0_i32, %c0_i32_0 : i32, i32
  }
  func.func @transform_6(%arg0: i32, %arg1: i32) -> (i32, i32) {
    %c0_i32 = arith.constant 0 : i32
    %c0_i32_0 = arith.constant 0 : i32
    %c0_i32_1 = arith.constant 0 : i32
    return %c0_i32, %c0_i32_0 : i32, i32
  }
  func.func @transform_7(%arg0: i32, %arg1: i32) -> (i32, i32) {
    %c0_i32 = arith.constant 0 : i32
    %c0_i32_0 = arith.constant 0 : i32
    %c0_i32_1 = arith.constant 0 : i32
    return %c0_i32, %c0_i32_0 : i32, i32
  }
  func.func @transform_8(%arg0: i32, %arg1: i32) -> (i32, i32) {
    %c0_i32 = arith.constant 0 : i32
    %c0_i32_0 = arith.constant 0 : i32
    %c0_i32_1 = arith.constant 0 : i32
    return %c0_i32, %c0_i32_0 : i32, i32
  }
  func.func @transform_9(%arg0: i32, %arg1: i32) -> (i32, i32, i32) {
    %c0_i32 = arith.constant 0 : i32
    %c0_i32_0 = arith.constant 0 : i32
    %c0_i32_1 = arith.constant 0 : i32
    return %arg0, %c0_i32, %c0_i32_0 : i32, i32, i32
  }
}

module attributes {stable_mosaic.version = 11 : i64} {
  func.func @_decoder_stack_kernel(%arg0: i32, %arg1: i32, %arg2: memref<1x16x128xf32, #tpu.memory_space<vmem>>, %arg3: memref<1x16x128xf32, #tpu.memory_space<vmem>>, %arg4: memref<1x128x128xbf16, #tpu.memory_space<vmem>>, %arg5: memref<128x128xbf16, #tpu.memory_space<vmem>>, %arg6: memref<128x256xbf16, #tpu.memory_space<vmem>>, %arg7: memref<1x256xf32, #tpu.memory_space<vmem>>, %arg8: memref<256x128xbf16, #tpu.memory_space<vmem>>, %arg9: memref<1x128xf32, #tpu.memory_space<vmem>>, %arg10: memref<1x16x128xf32, #tpu.memory_space<vmem>>) attributes {dimension_semantics = [#tpu.dimension_semantics<parallel>, #tpu.dimension_semantics<parallel>], iteration_bounds = array<i64: 2, 1>, scalar_prefetch = 0 : i64, scratch_operands = 0 : i64, tpu.core_type = #tpu.core_type<tc>, window_params = [{transform_indices = @transform_0, window_bounds = array<i64: 1, 16, 128>}, {transform_indices = @transform_1, window_bounds = array<i64: 1, 16, 128>}, {transform_indices = @transform_2, window_bounds = array<i64: 1, 128, 128>}, {pipeline_mode = #tpu.pipeline_mode<synchronous>, transform_indices = @transform_3, window_bounds = array<i64: 128, 128>}, {pipeline_mode = #tpu.pipeline_mode<synchronous>, transform_indices = @transform_4, window_bounds = array<i64: 128, 256>}, {pipeline_mode = #tpu.pipeline_mode<synchronous>, transform_indices = @transform_5, window_bounds = array<i64: 1, 256>}, {pipeline_mode = #tpu.pipeline_mode<synchronous>, transform_indices = @transform_6, window_bounds = array<i64: 256, 128>}, {pipeline_mode = #tpu.pipeline_mode<synchronous>, transform_indices = @transform_7, window_bounds = array<i64: 1, 128>}, {transform_indices = @transform_8, window_bounds = array<i64: 1, 16, 128>}]} {
    %c0 = arith.constant 0 : index
    %c0_0 = arith.constant 0 : index
    %c0_1 = arith.constant 0 : index
    %0 = vector.load %arg2[%c0, %c0_0, %c0_1] : memref<1x16x128xf32, #tpu.memory_space<vmem>>, vector<1x16x128xf32>
    %1 = vector.shape_cast %0 : vector<1x16x128xf32> to vector<16x128xf32>
    %c0_2 = arith.constant 0 : index
    %c0_3 = arith.constant 0 : index
    %c0_4 = arith.constant 0 : index
    %2 = vector.load %arg4[%c0_2, %c0_3, %c0_4] : memref<1x128x128xbf16, #tpu.memory_space<vmem>>, vector<1x128x128xbf16>
    %3 = vector.shape_cast %2 : vector<1x128x128xbf16> to vector<128x128xbf16>
    %c0_5 = arith.constant 0 : index
    %c0_6 = arith.constant 0 : index
    %c0_7 = arith.constant 0 : index
    %4 = vector.load %arg3[%c0_5, %c0_6, %c0_7] : memref<1x16x128xf32, #tpu.memory_space<vmem>>, vector<1x16x128xf32>
    %5 = vector.shape_cast %4 : vector<1x16x128xf32> to vector<16x128xf32>
    %6 = arith.truncf %5 : vector<16x128xf32> to vector<16x128xbf16>
    %c0_8 = arith.constant 0 : index
    %c0_9 = arith.constant 0 : index
    %7 = vector.load %arg5[%c0_8, %c0_9] : memref<128x128xbf16, #tpu.memory_space<vmem>>, vector<128x128xbf16>
    %cst = arith.constant dense<0.000000e+00> : vector<16x128xf32>
    %8 = tpu.matmul %6, %7, %cst {dimension_numbers = #tpu.dot_dimension_numbers<[1], [0], [0], [1], [0, 0, 1, 1], [], []>} : vector<16x128xbf16>, vector<128x128xbf16>, vector<16x128xf32> -> vector<16x128xf32>
    %c0_10 = arith.constant 0 : index
    %c0_11 = arith.constant 0 : index
    %9 = vector.load %arg6[%c0_10, %c0_11] : memref<128x256xbf16, #tpu.memory_space<vmem>>, vector<128x256xbf16>
    %c0_12 = arith.constant 0 : index
    %c0_13 = arith.constant 0 : index
    %10 = vector.load %arg8[%c0_12, %c0_13] : memref<256x128xbf16, #tpu.memory_space<vmem>>, vector<256x128xbf16>
    %c0_14 = arith.constant 0 : index
    %c0_15 = arith.constant 0 : index
    %11 = vector.load %arg7[%c0_14, %c0_15] : memref<1x256xf32, #tpu.memory_space<vmem>>, vector<1x256xf32>
    %c0_16 = arith.constant 0 : index
    %c0_17 = arith.constant 0 : index
    %12 = vector.load %arg9[%c0_16, %c0_17] : memref<1x128xf32, #tpu.memory_space<vmem>>, vector<1x128xf32>
    %c0_i32 = arith.constant 0 : i32
    %13 = arith.truncf %1 : vector<16x128xf32> to vector<16x128xbf16>
    %cst_18 = arith.constant dense<0.000000e+00> : vector<16x128xf32>
    %14 = tpu.matmul %13, %3, %cst_18 {dimension_numbers = #tpu.dot_dimension_numbers<[1], [0], [0], [1], [0, 0, 1, 1], [], []>} : vector<16x128xbf16>, vector<128x128xbf16>, vector<16x128xf32> -> vector<16x128xf32>
    %15 = arith.addf %1, %14 : vector<16x128xf32>
    %16 = arith.addf %15, %8 : vector<16x128xf32>
    %17 = arith.truncf %16 : vector<16x128xf32> to vector<16x128xbf16>
    %cst_19 = arith.constant dense<0.000000e+00> : vector<16x256xf32>
    %18 = tpu.matmul %17, %9, %cst_19 {dimension_numbers = #tpu.dot_dimension_numbers<[1], [0], [0], [1], [0, 0, 1, 1], [], []>} : vector<16x128xbf16>, vector<128x256xbf16>, vector<16x256xf32> -> vector<16x256xf32>
    %19 = vector.broadcast %11 : vector<1x256xf32> to vector<16x256xf32>
    %20 = arith.addf %18, %19 : vector<16x256xf32>
    %cst_20 = arith.constant 0.000000e+00 : f32
    %21 = vector.broadcast %cst_20 : f32 to vector<16x256xf32>
    %22 = arith.maximumf %20, %21 : vector<16x256xf32>
    %23 = arith.truncf %22 : vector<16x256xf32> to vector<16x256xbf16>
    %cst_21 = arith.constant dense<0.000000e+00> : vector<16x128xf32>
    %24 = tpu.matmul %23, %10, %cst_21 {dimension_numbers = #tpu.dot_dimension_numbers<[1], [0], [0], [1], [0, 0, 1, 1], [], []>} : vector<16x256xbf16>, vector<256x128xbf16>, vector<16x128xf32> -> vector<16x128xf32>
    %25 = arith.addf %16, %24 : vector<16x128xf32>
    %26 = vector.broadcast %12 : vector<1x128xf32> to vector<16x128xf32>
    %27 = arith.addf %25, %26 : vector<16x128xf32>
    %c1_i32 = arith.constant 1 : i32
    %28 = arith.truncf %27 : vector<16x128xf32> to vector<16x128xbf16>
    %cst_22 = arith.constant dense<0.000000e+00> : vector<16x128xf32>
    %29 = tpu.matmul %28, %3, %cst_22 {dimension_numbers = #tpu.dot_dimension_numbers<[1], [0], [0], [1], [0, 0, 1, 1], [], []>} : vector<16x128xbf16>, vector<128x128xbf16>, vector<16x128xf32> -> vector<16x128xf32>
    %30 = arith.addf %27, %29 : vector<16x128xf32>
    %31 = arith.addf %30, %8 : vector<16x128xf32>
    %32 = arith.truncf %31 : vector<16x128xf32> to vector<16x128xbf16>
    %cst_23 = arith.constant dense<0.000000e+00> : vector<16x256xf32>
    %33 = tpu.matmul %32, %9, %cst_23 {dimension_numbers = #tpu.dot_dimension_numbers<[1], [0], [0], [1], [0, 0, 1, 1], [], []>} : vector<16x128xbf16>, vector<128x256xbf16>, vector<16x256xf32> -> vector<16x256xf32>
    %34 = vector.broadcast %11 : vector<1x256xf32> to vector<16x256xf32>
    %35 = arith.addf %33, %34 : vector<16x256xf32>
    %cst_24 = arith.constant 0.000000e+00 : f32
    %36 = vector.broadcast %cst_24 : f32 to vector<16x256xf32>
    %37 = arith.maximumf %35, %36 : vector<16x256xf32>
    %38 = arith.truncf %37 : vector<16x256xf32> to vector<16x256xbf16>
    %cst_25 = arith.constant dense<0.000000e+00> : vector<16x128xf32>
    %39 = tpu.matmul %38, %10, %cst_25 {dimension_numbers = #tpu.dot_dimension_numbers<[1], [0], [0], [1], [0, 0, 1, 1], [], []>} : vector<16x256xbf16>, vector<256x128xbf16>, vector<16x128xf32> -> vector<16x128xf32>
    %40 = arith.addf %31, %39 : vector<16x128xf32>
    %41 = vector.broadcast %12 : vector<1x128xf32> to vector<16x128xf32>
    %42 = arith.addf %40, %41 : vector<16x128xf32>
    %c2_i32 = arith.constant 2 : i32
    %43 = arith.truncf %42 : vector<16x128xf32> to vector<16x128xbf16>
    %cst_26 = arith.constant dense<0.000000e+00> : vector<16x128xf32>
    %44 = tpu.matmul %43, %3, %cst_26 {dimension_numbers = #tpu.dot_dimension_numbers<[1], [0], [0], [1], [0, 0, 1, 1], [], []>} : vector<16x128xbf16>, vector<128x128xbf16>, vector<16x128xf32> -> vector<16x128xf32>
    %45 = arith.addf %42, %44 : vector<16x128xf32>
    %46 = arith.addf %45, %8 : vector<16x128xf32>
    %47 = arith.truncf %46 : vector<16x128xf32> to vector<16x128xbf16>
    %cst_27 = arith.constant dense<0.000000e+00> : vector<16x256xf32>
    %48 = tpu.matmul %47, %9, %cst_27 {dimension_numbers = #tpu.dot_dimension_numbers<[1], [0], [0], [1], [0, 0, 1, 1], [], []>} : vector<16x128xbf16>, vector<128x256xbf16>, vector<16x256xf32> -> vector<16x256xf32>
    %49 = vector.broadcast %11 : vector<1x256xf32> to vector<16x256xf32>
    %50 = arith.addf %48, %49 : vector<16x256xf32>
    %cst_28 = arith.constant 0.000000e+00 : f32
    %51 = vector.broadcast %cst_28 : f32 to vector<16x256xf32>
    %52 = arith.maximumf %50, %51 : vector<16x256xf32>
    %53 = arith.truncf %52 : vector<16x256xf32> to vector<16x256xbf16>
    %cst_29 = arith.constant dense<0.000000e+00> : vector<16x128xf32>
    %54 = tpu.matmul %53, %10, %cst_29 {dimension_numbers = #tpu.dot_dimension_numbers<[1], [0], [0], [1], [0, 0, 1, 1], [], []>} : vector<16x256xbf16>, vector<256x128xbf16>, vector<16x128xf32> -> vector<16x128xf32>
    %55 = arith.addf %46, %54 : vector<16x128xf32>
    %56 = vector.broadcast %12 : vector<1x128xf32> to vector<16x128xf32>
    %57 = arith.addf %55, %56 : vector<16x128xf32>
    %c0_30 = arith.constant 0 : index
    %c0_31 = arith.constant 0 : index
    %c0_32 = arith.constant 0 : index
    %58 = vector.load %arg10[%c0_30, %c0_31, %c0_32] : memref<1x16x128xf32, #tpu.memory_space<vmem>>, vector<1x16x128xf32>
    %59 = vector.shape_cast %58 : vector<1x16x128xf32> to vector<16x128xf32>
    %60 = vector.shape_cast %57 : vector<16x128xf32> to vector<1x16x128xf32>
    tpu.vector_store %arg10[%c0_30, %c0_31, %c0_32], %60 {strides = array<i32>} : memref<1x16x128xf32, #tpu.memory_space<vmem>>, vector<1x16x128xf32>,
    return
  }
  func.func @transform_0(%arg0: i32, %arg1: i32) -> (i32, i32, i32) {
    %c0_i32 = arith.constant 0 : i32
    %c0_i32_0 = arith.constant 0 : i32
    return %arg0, %arg1, %c0_i32 : i32, i32, i32
  }
  func.func @transform_1(%arg0: i32, %arg1: i32) -> (i32, i32, i32) {
    %c0_i32 = arith.constant 0 : i32
    %c0_i32_0 = arith.constant 0 : i32
    return %arg0, %arg1, %c0_i32 : i32, i32, i32
  }
  func.func @transform_2(%arg0: i32, %arg1: i32) -> (i32, i32, i32) {
    %c0_i32 = arith.constant 0 : i32
    %c0_i32_0 = arith.constant 0 : i32
    %c0_i32_1 = arith.constant 0 : i32
    return %arg0, %c0_i32, %c0_i32_0 : i32, i32, i32
  }
  func.func @transform_3(%arg0: i32, %arg1: i32) -> (i32, i32) {
    %c0_i32 = arith.constant 0 : i32
    %c0_i32_0 = arith.constant 0 : i32
    %c0_i32_1 = arith.constant 0 : i32
    return %c0_i32, %c0_i32_0 : i32, i32
  }
  func.func @transform_4(%arg0: i32, %arg1: i32) -> (i32, i32) {
    %c0_i32 = arith.constant 0 : i32
    %c0_i32_0 = arith.constant 0 : i32
    %c0_i32_1 = arith.constant 0 : i32
    return %c0_i32, %c0_i32_0 : i32, i32
  }
  func.func @transform_5(%arg0: i32, %arg1: i32) -> (i32, i32) {
    %c0_i32 = arith.constant 0 : i32
    %c0_i32_0 = arith.constant 0 : i32
    %c0_i32_1 = arith.constant 0 : i32
    return %c0_i32, %c0_i32_0 : i32, i32
  }
  func.func @transform_6(%arg0: i32, %arg1: i32) -> (i32, i32) {
    %c0_i32 = arith.constant 0 : i32
    %c0_i32_0 = arith.constant 0 : i32
    %c0_i32_1 = arith.constant 0 : i32
    return %c0_i32, %c0_i32_0 : i32, i32
  }
  func.func @transform_7(%arg0: i32, %arg1: i32) -> (i32, i32) {
    %c0_i32 = arith.constant 0 : i32
    %c0_i32_0 = arith.constant 0 : i32
    %c0_i32_1 = arith.constant 0 : i32
    return %c0_i32, %c0_i32_0 : i32, i32
  }
  func.func @transform_8(%arg0: i32, %arg1: i32) -> (i32, i32, i32) {
    %c0_i32 = arith.constant 0 : i32
    %c0_i32_0 = arith.constant 0 : i32
    return %arg0, %arg1, %c0_i32 : i32, i32, i32
  }
}

</mosaic_0001>

<bundles_post_ra>
// kernel: _galerkin_decoder_impl.3
= control target key start
LH: loop header
LB: loop body
LE: loop exit
PB: predicated region body
PF: predicated region fallthrough
CT: control target
= control target key end

     0   :  { %13 = vsyncpa [#allocation3], 0  ;;  %s2412_s0 = inlined_call_operand.vmem [shape: f32[2,16,128], index: 0, kind: input, shape index: {}]   ;;  %s2413_s1 = inlined_call_operand.vmem [shape: f32[2,16,128], index: 1, kind: input, shape index: {}]   ;;  %s2414_s2 = inlined_call_operand.vmem [shape: bf16[2,128,128], index: 2, kind: input, shape index: {}]   ;;  %s2415_s3 = inlined_call_operand.vmem [shape: bf16[128,128], index: 3, kind: input, shape index: {}]   ;;  %s2416_s4 = inlined_call_operand.vmem [shape: bf16[128,256], index: 4, kind: input, shape index: {}]   ;;  %s2417_s5 = inlined_call_operand.vmem [shape: f32[1,256], index: 5, kind: input, shape index: {}]   ;;  %s2418_s6 = inlined_call_operand.vmem [shape: bf16[256,128], index: 6, kind: input, shape index: {}]   ;;  %s2419_s7 = inlined_call_operand.vmem [shape: f32[1,128], index: 7, kind: input, shape index: {}]   ;;  %s2420_s8 = inlined_call_operand.hbm [shape: f32[2,16,128], index: 8, kind: output, shape index: {}]  }
   0x1   :  { %15 = vsyncpa [#allocation3 + $0x1], 0  ;;  %s1858_s27 = smov 0   ;;  %s1860_s28 = smov 0  }
   0x2   :  { %s1862_s29 = smov 0   ;;  %s1864_s30 = smov 0  }
   0x3   :  { %s1866_s9 = smov 0   ;;  %s1868_s10 = smov 0  }
   0x4 LB: > { %s1359_s11 = sadd.s32 4294967295, %s1805_s10   ;;  %s1360_s12 = sadd.s32 4294967294, %s1805_s10   ;;  %s1805_s10 = sphi %s1868_s10, %s21_s10   ;;  %s1801_s9 = sphi %s1866_s9, %s2427_s9   ;;  %s1797_s30 = sphi %s1864_s30, %s2426_s30   ;;  %s1793_s29 = sphi %s1862_s29, %s2425_s29   ;;  %s1789_s28 = sphi %s1860_s28, %s2424_s28   ;;  %s1785_s27 = sphi %s1858_s27, %s2423_s27  }
   0x5   : > { %s33_s13 = sadd.s32 1, %s1801_s9  ;;  %s229_s14 = sadd.s32 1, %s1793_s29 }
   0x6   : > { %p35_p0 = scmp.ge.s32.totalorder %s33_s13, 2  ;;  %p239_p1 = scmp.ne.s32.totalorder %s1793_s29, %s1789_s28 }
   0x7   : > { %p240_p2 = scmp.eq.s32.totalorder %s1359_s11, 1  ;;  %p245_p3 = scmp.ne.s32.totalorder %s1789_s28, %s1785_s27 }
   0x8   : > { %s2429_s13 = smov (%p35_p0, %s33_s13), 0  ;;  %p246_p5 = scmp.eq.s32.totalorder %s1360_s12, 1 }
   0x9   : > { %p1898_p4 = por %p240_p2, %p239_p1  ;;  %s224_s16 = ssub.s32 %s1801_s9, %s2429_s13 }
   0xa   : > { %p1363_p6 = scmp.ge.s32.totalorder %s1805_s10, 1  ;;  %p227_p7 = scmp.eq.s32.totalorder %s224_s16, 0 }
   0xb   : > { %p1905_p8 = por %p246_p5, %p245_p3  ;;  %p313_p9 = scmp.lt.s32.totalorder %s1805_s10, 3 }
   0xc   : > { %s1911_s18 = scalar_select %p227_p7, %s1793_s29, %s229_s14  }
   0xd   : > { %p314_p10 = pnand %p1363_p6, %p313_p9 }
   0xe   : > { %v1671_v0 = vld [vmem:[%s2415_s3] sm:$0xff] (!%p314_p10)   ;;  %v1807_v1 = vmov (!%p314_p10), 0.0   ;;  %p366_p11 = scmp.lt.s32.totalorder (!%p314_p10), %s1797_s30, 1  ;;  %v1673_v2 = vld [vmem:[%s2415_s3 + $0x8] sm:$0xff] (!%p314_p10)   ;;  %vm1808_vm0 = vmmov (!%p314_p10), 0   ;;  %v1675_v3 = vld [vmem:[%s2415_s3 + $0x10] sm:$0xff] (!%p314_p10)  }
   0xf   : > { %317 = sbr.rel (%p314_p10) target bundleno = 2066 (0x812), region = 52  ;;  %1531 = vmatprep.subr.bf16.mxu0 (!%p314_p10), %v1807_v1  ;;  %1551 = vmatprep.subr.bf16.mxu1 (!%p314_p10), %v1807_v1  ;;  %v1677_v6 = vld [vmem:[%s2415_s3 + $0x18] sm:$0xff] (!%p314_p10)   ;;  %v1679_v8 = vld [vmem:[%s2415_s3 + $0x20] sm:$0xff] (!%p314_p10)   ;;  %v1681_v10 = vld [vmem:[%s2415_s3 + $0x28] sm:$0xff] (!%p314_p10)   ;;  %v1809_v39 = vmov (!%p314_p10), 0   ;;  %s362_s21 = sand.u32 (!%p314_p10), 1, %s1789_s28  }
  0x10   : > { %1532 = vmatpush3.bf16.msra.mxu0 (!%p314_p10), %v1671_v0  ;;  %1547 = vmatprep.mubr.msk.bf16.mxu0 (!%p314_p10), %vm1808_vm0, %v1807_v1  ;;  %v1683_v12 = vld [vmem:[%s2415_s3 + $0x30] sm:$0xff] (!%p314_p10)   ;;  %v1685_v14 = vld [vmem:[%s2415_s3 + $0x38] sm:$0xff] (!%p314_p10)   ;;  %v1993_v17 = vld [vmem:[%s2416_s4 + $0x4] ss:$8 sps:$4 sm:$0xff] (!%p314_p10)   ;;  %s1364_s22 = sshll.u32 (!%p314_p10), %s362_s21, 4  ;;  %s1428_s26 = sshll.u32 (!%p314_p10), %s1797_s30, 8 }
  0x11   : > { %1533 = vmatprep.subr.bf16.mxu0 (!%p314_p10), %v1807_v1  ;;  %1567 = vmatprep.mubr.msk.bf16.mxu1 (!%p314_p10), %vm1808_vm0, %v1807_v1  ;;  %v2006_v19 = vld [vmem:[%s2416_s4] ss:$8 sps:$4 sm:$0xff] (!%p314_p10)   ;;  %v2012_v21 = vld [vmem:[%s2416_s4 + $0x14] ss:$8 sps:$4 sm:$0xff] (!%p314_p10)   ;;  %v2026_v25 = vld [vmem:[%s2416_s4 + $0x10] ss:$8 sps:$4 sm:$0xff] (!%p314_p10)  }
  0x12   : > { %v2032_v26 = vld [vmem:[%s2416_s4 + $0x24] ss:$8 sps:$4 sm:$0xff] (!%p314_p10)   ;;  %v2044_v28 = vld [vmem:[%s2416_s4 + $0x20] ss:$8 sps:$4 sm:$0xff] (!%p314_p10)   ;;  %v2050_v29 = vld [vmem:[%s2416_s4 + $0x34] ss:$8 sps:$4 sm:$0xff] (!%p314_p10)  }
  0x13   : > { %v2056_v30 = vld [vmem:[%s2416_s4 + $0x30] ss:$8 sps:$4 sm:$0xff] (!%p314_p10)   ;;  %v2062_v31 = vld [vmem:[%s2416_s4 + $0x44] ss:$8 sps:$4 sm:$0xff] (!%p314_p10)   ;;  %v2068_v32 = vld [vmem:[%s2416_s4 + $0x40] ss:$8 sps:$4 sm:$0xff] (!%p314_p10)  }
  0x14   : > { %1534 = vmatpush3.bf16.msra.mxu0 (!%p314_p10), %v1673_v2  ;;  %v2074_v33 = vld [vmem:[%s2416_s4 + $0x54] ss:$8 sps:$4 sm:$0xff] (!%p314_p10)   ;;  %v2080_v34 = vld [vmem:[%s2416_s4 + $0x50] ss:$8 sps:$4 sm:$0xff] (!%p314_p10)   ;;  %v2087_v35 = vld [vmem:[%s2416_s4 + $0x64] ss:$8 sps:$4 sm:$0xff] (!%p314_p10)  }
  0x15   : > { %1535 = vmatprep.subr.bf16.mxu0 (!%p314_p10), %v1807_v1  ;;  %v2092_v36 = vld [vmem:[%s2416_s4 + $0x60] ss:$8 sps:$4 sm:$0xff] (!%p314_p10)   ;;  %v2099_v37 = vld [vmem:[%s2416_s4 + $0x74] ss:$8 sps:$4 sm:$0xff] (!%p314_p10)   ;;  %v2104_v38 = vld [vmem:[%s2416_s4 + $0x70] ss:$8 sps:$4 sm:$0xff] (!%p314_p10)  }
  0x16   : > { %s1923_s23 = scalar_select %p366_p11, %s1797_s30, 1  ;;  %v2113_v40 = vld [vmem:[%s2418_s6 + $0x40] sm:$0xff]   ;;  %v2123_v42 = vld [vmem:[%s2418_s6 + $0x48] sm:$0xff]   ;;  %v2136_v44 = vld [vmem:[%s2418_s6 + $0x50] sm:$0xff]  }
  0x17   : > { %v2118_v41 = vld [vmem:[%s2418_s6] sm:$0xff]   ;;  %v2130_v43 = vld [vmem:[%s2418_s6 + $0x8] sm:$0xff]   ;;  %v2142_v45 = vld [vmem:[%s2418_s6 + $0x10] sm:$0xff]   ;;  %s2366_s19 = scalar_lea.sflag [#allocation3], %s362_s21 }
  0x18   : > { %s1427_s24 = sshll.u32 %s1923_s23, 6  ;;  %1536 = vmatpush3.bf16.msra.mxu0 %v1675_v3  ;;  %s1425_s25 = sshll.u32 %s1923_s23, 4  ;;  %v2148_v46 = vld [vmem:[%s2418_s6 + $0x58] sm:$0xff]   ;;  %v2160_v48 = vld [vmem:[%s2418_s6 + $0x60] sm:$0xff]   ;;  %v2172_v50 = vld [vmem:[%s2418_s6 + $0x68] sm:$0xff]  }
  0x19   : > { %s1934_s11 = scalar_lea.vmem %s2414_s2, %s1427_s24  ;;  %1537 = vmatprep.subr.bf16.mxu0 %v1807_v1  ;;  %s383_s14 = scalar_lea.vmem %s2413_s1, %s1425_s25  ;;  %v2154_v47 = vld [vmem:[%s2418_s6 + $0x18] sm:$0xff]   ;;  %v2166_v49 = vld [vmem:[%s2418_s6 + $0x20] sm:$0xff]   ;;  %v2211_v0 = vld [vmem:[%s2418_s6 + $0x28] sm:$0xff]  }
  0x1a   : > { %v1940_v4 = vld [vmem:[%s1934_s11] sm:$0xff]   ;;  %v1945_v5 = vld [vmem:[%s1934_s11 + $0x8] sm:$0xff]   ;;  %v1954_v7 = vld [vmem:[%s1934_s11 + $0x10] sm:$0xff]   ;;  %s373_s12 = scalar_lea.vmem %s2412_s0, %s1425_s25  ;;  %s1810_s23 = smov [#allocation2]  }
  0x1b   : > { %1552 = vmatpush3.bf16.msra.mxu1 %v1940_v4  ;;  %v1963_v9 = vld [vmem:[%s1934_s11 + $0x18] sm:$0xff]   ;;  %v1973_v11 = vld [vmem:[%s1934_s11 + $0x20] sm:$0xff]   ;;  %v1983_v13 = vld [vmem:[%s1934_s11 + $0x28] sm:$0xff]   ;;  %s1731_s25 = sshll.u32 %s1810_s23, 4  ;;  %s1732_s25 = int_to_ptr.vmem [resolvable:$false] %s1731_s25 }
  0x1c   : > { %1553 = vmatprep.subr.bf16.mxu1 %v1807_v1  ;;  %1538 = vmatpush3.bf16.msra.mxu0 %v1677_v6  ;;  %v410_v15 = vld [vmem:[%s383_s14] sm:$0xff]  ;;  %v411_v16 = vld [vmem:[%s383_s14 + $0x8] sm:$0xff]  ;;  %v1997_v18 = vld [vmem:[%s1934_s11 + $0x30] sm:$0xff]   ;;  %s2363_s14 = scalar_lea.hbm %s2420_s8, %s1428_s26  ;;  %s1733_s20 = scalar_lea.vmem %s1732_s25, 512 }
  0x1d   : > { %1539 = vmatprep.subr.bf16.mxu0 %v1807_v1  ;;  %v412_v20 = vpack.c.bf16 %v411_v16, %v410_v15  ;;  %v2016_v22 = vld [vmem:[%s1934_s11 + $0x38] sm:$0xff]   ;;  %v2018_v23 = vld [vmem:[%s373_s12] sm:$0xff]  ;;  %v2020_v24 = vld [vmem:[%s373_s12 + $0x8] sm:$0xff]  ;;  %s364_s11 = scalar_lea.vmem [#allocation2], %s1364_s22 }
  0x1e   : > { %v568_v27 = vpack.c.bf16 %v2020_v24, %v2018_v23  ;;  %v2217_v2 = vld [vmem:[%s2418_s6 + $0x70] sm:$0xff]   ;;  %v2229_v6 = vld [vmem:[%s2418_s6 + $0x78] sm:$0xff]   ;;  %v566_v15 = vld [vmem:[%s2417_s5] sm:$0x3]  ;;  %s1250_s24 = sshll.u32 %s364_s11, 4  ;;  %s2358_s24 = int_to_ptr.vmem [resolvable:$true] %s1250_s24 }
  0x1f   : > { %1554 = vmatpush3.bf16.msra.mxu1 %v1945_v5  ;;  %v2222_v3 = vld [vmem:[%s2418_s6 + $0x30] sm:$0xff]   ;;  %s1727_s30 = scalar_lea.vmem %s2358_s24, 256  ;;  %p1734_p1 = scmp.lt.s32.totalorder %s2358_s24, %s1732_s25 }
  0x20   : > { %1555 = vmatprep.subr.bf16.mxu1 %v1807_v1  ;;  %1540 = vmatpush3.bf16.msra.mxu0 %v1679_v8  ;;  %v2234_v8 = vld [vmem:[%s2418_s6 + $0x38] sm:$0xff]   ;;  %p1728_p12 = scmp.ne.s32.totalorder %s2358_s24, %s1727_s30  ;;  %p1735_p2 = scmp.lt.s32.totalorder %s1733_s20, %s1727_s30 }
  0x21   : > { %1541 = vmatprep.subr.bf16.mxu0 %v1807_v1 }
  0x22   : > { %p1729_p13 = pnand %p1728_p12, %p1898_p4  ;;  %p1736_p3 = por %p1735_p2, %p1734_p1 }
  0x23   : > { %1556 = vmatpush3.bf16.msra.mxu1 %v1954_v7 }
  0x24   : > { %1557 = vmatprep.subr.bf16.mxu1 %v1807_v1  ;;  %1542 = vmatpush3.bf16.msra.mxu0 %v1681_v10  ;;  %v664_v10 = vlaneseq  ;;  %p1730_p0 = pneg %p1729_p13 }
  0x25   : > { %1543 = vmatprep.subr.bf16.mxu0 %v1807_v1 }
  0x26   : > { %p1737_p5 = pnand %p1736_p3, %p1730_p0 }
  0x27   : > { %1558 = vmatpush3.bf16.msra.mxu1 %v1963_v9 }
  0x28   : > { %1559 = vmatprep.subr.bf16.mxu1 %v1807_v1  ;;  %1544 = vmatpush3.bf16.msra.mxu0 %v1683_v12  ;;  %v665_v12 = vshrl.u32 %v664_v10, 7 }
  0x29   : > { %1545 = vmatprep.subr.bf16.mxu0 %v1807_v1 }
  0x2a   : > { %v670_v16 = vsub.s32 1, %v665_v12 }
  0x2b   : > { %1560 = vmatpush3.bf16.msra.mxu1 %v1973_v11 }
  0x2c   : > { %1561 = vmatprep.subr.bf16.mxu1 %v1807_v1  ;;  %1546 = vmatpush3.bf16.msra.mxu0 %v1685_v14  ;;  %v666_v14 = vsub.s32 0, %v665_v12 }
  0x2d   : > { %754 = vmatprep.subr.bf16.mxu0 %v1993_v17 }
  0x2f   : > { %1562 = vmatpush3.bf16.msra.mxu1 %v1983_v13  ;;  %1548 = vmatmul.mubr.bf16.vlgmr.msra.gmra.mrb[0].mxu0 %v412_v20  ;;  %v2242_v20 = vrot.slane %v566_v15, %v666_v14 }
  0x30   : > { %1563 = vmatprep.subr.bf16.mxu1 %v1807_v1  ;;  %755 = vmatpush1.bf16.msra.mxu0 %v2006_v19 }
  0x31   : > { %756 = vmatprep.subr.bf16.mxu0 %v2012_v21  ;;  %786 = vmatprep.mubr.bf16.mxu0 %v1809_v39 }
  0x33   : > { %1564 = vmatpush3.bf16.msra.mxu1 %v1997_v18 }
  0x34   : > { %1565 = vmatprep.subr.bf16.mxu1 %v1807_v1  ;;  %757 = vmatpush1.bf16.msra.mxu0 %v2026_v25 }
  0x35   : > { %758 = vmatprep.subr.bf16.mxu0 %v2032_v26 }
  0x37   : > { %1566 = vmatpush3.bf16.msra.mxu1 %v2016_v22 }
  0x38   : > { %759 = vmatpush1.bf16.msra.mxu0 %v2044_v28  ;;  %1447 = vmatprep.subr.bf16.mxu1 %v2113_v40 }
  0x39   : > { %760 = vmatprep.subr.bf16.mxu0 %v2050_v29 }
  0x3a   : > { %1568 = vmatmul.mubr.bf16.vlgmr.msra.gmra.mrb[0].mxu1 %v568_v27 }
  0x3b   : > { %1448 = vmatpush3.bf16.msra.mxu1 %v2118_v41 }
  0x3c   : > { %761 = vmatpush1.bf16.msra.mxu0 %v2056_v30  ;;  %1449 = vmatprep.subr.bf16.mxu1 %v2123_v42 }
  0x3d   : > { %762 = vmatprep.subr.bf16.mxu0 %v2062_v31 }
  0x3f   : > { %1450 = vmatpush3.bf16.msra.mxu1 %v2130_v43 }
  0x40   : > { %763 = vmatpush1.bf16.msra.mxu0 %v2068_v32  ;;  %1451 = vmatprep.subr.bf16.mxu1 %v2136_v44 }
  0x41   : > { %764 = vmatprep.subr.bf16.mxu0 %v2074_v33 }
  0x43   : > { %1452 = vmatpush3.bf16.msra.mxu1 %v2142_v45 }
  0x44   : > { %765 = vmatpush1.bf16.msra.mxu0 %v2080_v34  ;;  %1453 = vmatprep.subr.bf16.mxu1 %v2148_v46 }
  0x45   : > { %766 = vmatprep.subr.bf16.mxu0 %v2087_v35 }
  0x47   : > { %1454 = vmatpush3.bf16.msra.mxu1 %v2154_v47 }
  0x48   : > { %767 = vmatpush1.bf16.msra.mxu0 %v2092_v36  ;;  %1455 = vmatprep.subr.bf16.mxu1 %v2160_v48 }
  0x49   : > { %768 = vmatprep.subr.bf16.mxu0 %v2099_v37 }
  0x4b   : > { %1456 = vmatpush3.bf16.msra.mxu1 %v2166_v49 }
  0x4c   : > { %769 = vmatpush1.bf16.msra.mxu0 %v2104_v38  ;;  %1457 = vmatprep.subr.bf16.mxu1 %v2172_v50 }
  0x4d   : > { %1571 = vmatprep.subr.bf16.mxu0 %v1807_v1 }
  0x4f   : > { %1458 = vmatpush3.bf16.msra.mxu1 %v2211_v0 }
  0x50   : > { %1459 = vmatprep.subr.bf16.mxu1 %v2217_v2 }
  0x53   : > { %1460 = vmatpush3.bf16.msra.mxu1 %v2222_v3 }
  0x54   : > { %1461 = vmatprep.subr.bf16.mxu1 %v2229_v6 }
  0x57   : > { %1462 = vmatpush3.bf16.msra.mxu1 %v2234_v8 }
  0x58   : > { %997 = vmatprep.subr.bf16.mxu1 %v1993_v17 }
 0x102   : > { %v2176_v51 = vpop.f32.mrb[0].mxu0 }
 0x103   : > { %v1549_v52 = vpop.f32.mrb[1].mxu0 }
 0x104   : > { %v2178_v53 = vpop.f32.mrb[2].mxu0 }
 0x105   : > { %v1550_v54 = vpop.f32.mrb[3].mxu0 }
 0x10d   : > { %v651_v55 = vpop.f32.mrb[0].mxu1 }
 0x10e   : > { %v658_v56 = vadd.f32 %v651_v55, %v2018_v23  ;;  %v1569_v57 = vpop.f32.mrb[1].mxu1  ;;  %v2244_v23 = vrot.slane %v566_v15, %v670_v16 }
 0x10f   : > { %v654_v58 = vpop.f32.mrb[2].mxu1 }
 0x110   : > { %v2182_v59 = vadd.f32 %v658_v56, %v2176_v51  ;;  %v659_v60 = vadd.f32 %v654_v58, %v2020_v24  ;;  %v1570_v61 = vpop.f32.mrb[3].mxu1 }
 0x112   : > { %v2186_v62 = vadd.f32 %v659_v60, %v2178_v53 }
 0x114   : > { %v662_v63 = vpack.c.bf16 %v2186_v62, %v2182_v59 }
 0x116   : > { %787 = vmatmul.mubr.bf16.vlgmr.msra.gmra.mrb[4].mxu0 %v662_v63 }
 0x117   : > { %1572 = vmatpush3.bf16.msra.mxu0 %v1940_v4  ;;  %1587 = vmatprep.mubr.msk.bf16.mxu0 %vm1808_vm0, %v1807_v1 }
 0x118   : > { %1573 = vmatprep.subr.bf16.mxu0 %v1807_v1 }
 0x11b   : > { %1574 = vmatpush3.bf16.msra.mxu0 %v1945_v5 }
 0x11c   : > { %1575 = vmatprep.subr.bf16.mxu0 %v1807_v1 }
 0x11f   : > { %1576 = vmatpush3.bf16.msra.mxu0 %v1954_v7 }
 0x120   : > { %1577 = vmatprep.subr.bf16.mxu0 %v1807_v1 }
 0x123   : > { %1578 = vmatpush3.bf16.msra.mxu0 %v1963_v9 }
 0x124   : > { %1579 = vmatprep.subr.bf16.mxu0 %v1807_v1 }
 0x127   : > { %1580 = vmatpush3.bf16.msra.mxu0 %v1973_v11 }
 0x128   : > { %1581 = vmatprep.subr.bf16.mxu0 %v1807_v1 }
 0x12b   : > { %1582 = vmatpush3.bf16.msra.mxu0 %v1983_v13 }
 0x12c   : > { %1583 = vmatprep.subr.bf16.mxu0 %v1807_v1 }
 0x12f   : > { %1584 = vmatpush3.bf16.msra.mxu0 %v1997_v18 }
 0x130   : > { %1585 = vmatprep.subr.bf16.mxu0 %v1807_v1 }
 0x133   : > { %1586 = vmatpush3.bf16.msra.mxu0 %v2016_v22 }
 0x134   : > { %1478 = vmatprep.subr.bf16.mxu0 %v2113_v40 }
 0x1e9   : > { %v788_v24 = vpop.f32.mrb[4].mxu0 }
 0x1ea   : > { %v789_v27 = vadd.f32 %v788_v24, %v2242_v20  ;;  %v790_v52 = vpop.f32.mrb[5].mxu0 }
 0x1eb   : > { %v791_v54 = vadd.f32 %v790_v52, %v2244_v23  ;;  %v792_v55 = vpop.f32.mrb[6].mxu0 }
 0x1ec   : > { %v793_v56 = vadd.f32 %v792_v55, %v2242_v20  ;;  %v794_v57 = vpop.f32.mrb[7].mxu0  ;;  %v797_v60 = vmax.f32 %v789_v27, 0.0 }
 0x1ed   : > { %v795_v58 = vadd.f32 %v794_v57, %v2244_v23  ;;  %v798_v63 = vmax.f32 %v791_v54, 0.0 }
 0x1ee   : > { %v799_v61 = vmax.f32 %v793_v56, 0.0  ;;  %v2271_v56 = vld [vmem:[%s2419_s7] ss:$0 sm:$0xff] }
 0x1ef   : > { %v800_v10 = vmax.f32 %v795_v58, 0.0 }
 0x1f0   : > { %v801_v12 = vpack.c.bf16 %v799_v61, %v797_v60 }
 0x1f1   : > { %v802_v14 = vpack.c.bf16 %v800_v10, %v798_v63 }
 0x1f3   : > { %931 = vmatprep.mubr.bf16.mxu1 %v802_v14 }
 0x1f4   : > { %932 = vmatmul.mubr.bf16.vlgmr.msra.gmra.mrb[4].mxu1 %v801_v12 }
 0x1f5   : > { %998 = vmatpush1.bf16.msra.mxu1 %v2006_v19  ;;  %1029 = vmatprep.mubr.bf16.mxu1 %v1809_v39 }
 0x1f6   : > { %999 = vmatprep.subr.bf16.mxu1 %v2012_v21 }
 0x1f9   : > { %1000 = vmatpush1.bf16.msra.mxu1 %v2026_v25 }
 0x1fa   : > { %1001 = vmatprep.subr.bf16.mxu1 %v2032_v26 }
 0x1fd   : > { %1002 = vmatpush1.bf16.msra.mxu1 %v2044_v28 }
 0x1fe   : > { %1003 = vmatprep.subr.bf16.mxu1 %v2050_v29 }
 0x201   : > { %1004 = vmatpush1.bf16.msra.mxu1 %v2056_v30 }
 0x202   : > { %1005 = vmatprep.subr.bf16.mxu1 %v2062_v31 }
 0x205   : > { %1006 = vmatpush1.bf16.msra.mxu1 %v2068_v32 }
 0x206   : > { %1007 = vmatprep.subr.bf16.mxu1 %v2074_v33 }
 0x209   : > { %1008 = vmatpush1.bf16.msra.mxu1 %v2080_v34 }
 0x20a   : > { %1009 = vmatprep.subr.bf16.mxu1 %v2087_v35 }
 0x20d   : > { %1010 = vmatpush1.bf16.msra.mxu1 %v2092_v36 }
 0x20e   : > { %1011 = vmatprep.subr.bf16.mxu1 %v2099_v37 }
 0x211   : > { %1012 = vmatpush1.bf16.msra.mxu1 %v2104_v38 }
 0x212   : > { %1591 = vmatprep.subr.bf16.mxu1 %v1807_v1 }
 0x2c7   : > { %v1463_v15 = vpop.f32.mrb[4].mxu1 }
 0x2c8   : > { %v1464_v16 = vpop.f32.mrb[5].mxu1 }
 0x2c9   : > { %v1465_v24 = vadd.f32 %v1464_v16, %v1463_v15  ;;  %v1466_v27 = vpop.f32.mrb[6].mxu1 }
 0x2ca   : > { %v1467_v52 = vpop.f32.mrb[7].mxu1 }
 0x2cb   : > { %v940_v54 = vadd.f32 %v1465_v24, %v2182_v59  ;;  %v1468_v55 = vadd.f32 %v1467_v52, %v1466_v27 }
 0x2cd   : > { %v941_v57 = vadd.f32 %v1468_v55, %v2186_v62  ;;  %v948_v58 = vadd.f32 %v2271_v56, %v940_v54 }
 0x2cf   : > { %v949_v60 = vadd.f32 %v2271_v56, %v941_v57 }
 0x2d1   : > { %v950_v61 = vpack.c.bf16 %v949_v60, %v948_v58 }
 0x2d3   : > { %1588 = vmatmul.mubr.bf16.vlgmr.msra.gmra.mrb[8].mxu0 %v950_v61 }
 0x2d4   : > { %1479 = vmatpush3.bf16.msra.mxu0 %v2118_v41 }
 0x2d5   : > { %1480 = vmatprep.subr.bf16.mxu0 %v2123_v42 }
 0x2d8   : > { %1481 = vmatpush3.bf16.msra.mxu0 %v2130_v43 }
 0x2d9   : > { %1482 = vmatprep.subr.bf16.mxu0 %v2136_v44 }
 0x2dc   : > { %1483 = vmatpush3.bf16.msra.mxu0 %v2142_v45 }
 0x2dd   : > { %1484 = vmatprep.subr.bf16.mxu0 %v2148_v46 }
 0x2e0   : > { %1485 = vmatpush3.bf16.msra.mxu0 %v2154_v47 }
 0x2e1   : > { %1486 = vmatprep.subr.bf16.mxu0 %v2160_v48 }
 0x2e4   : > { %1487 = vmatpush3.bf16.msra.mxu0 %v2166_v49 }
 0x2e5   : > { %1488 = vmatprep.subr.bf16.mxu0 %v2172_v50 }
 0x2e8   : > { %1489 = vmatpush3.bf16.msra.mxu0 %v2211_v0 }
 0x2e9   : > { %1490 = vmatprep.subr.bf16.mxu0 %v2217_v2 }
 0x2ec   : > { %1491 = vmatpush3.bf16.msra.mxu0 %v2222_v3 }
 0x2ed   : > { %1492 = vmatprep.subr.bf16.mxu0 %v2229_v6 }
 0x2f0   : > { %1493 = vmatpush3.bf16.msra.mxu0 %v2234_v8 }
 0x2f1   : > { %1138 = vmatprep.subr.bf16.mxu0 %v1993_v17 }
 0x3a6   : > { %v985_v59 = vpop.f32.mrb[8].mxu0 }
 0x3a7   : > { %v992_v62 = vadd.f32 %v985_v59, %v948_v58  ;;  %v1589_v63 = vpop.f32.mrb[9].mxu0 }
 0x3a8   : > { %v988_v10 = vpop.f32.mrb[10].mxu0 }
 0x3a9   : > { %v994_v12 = vadd.f32 %v992_v62, %v2176_v51  ;;  %v993_v14 = vadd.f32 %v988_v10, %v949_v60  ;;  %v1590_v15 = vpop.f32.mrb[11].mxu0 }
 0x3ab   : > { %v995_v16 = vadd.f32 %v993_v14, %v2178_v53 }
 0x3ad   : > { %v996_v24 = vpack.c.bf16 %v995_v16, %v994_v12 }
 0x3af   : > { %1030 = vmatmul.mubr.bf16.vlgmr.msra.gmra.mrb[8].mxu1 %v996_v24 }
 0x3b0   : > { %1592 = vmatpush3.bf16.msra.mxu1 %v1940_v4  ;;  %1607 = vmatprep.mubr.msk.bf16.mxu1 %vm1808_vm0, %v1807_v1 }
 0x3b1   : > { %1593 = vmatprep.subr.bf16.mxu1 %v1807_v1 }
 0x3b4   : > { %1594 = vmatpush3.bf16.msra.mxu1 %v1945_v5 }
 0x3b5   : > { %1595 = vmatprep.subr.bf16.mxu1 %v1807_v1 }
 0x3b8   : > { %1596 = vmatpush3.bf16.msra.mxu1 %v1954_v7 }
 0x3b9   : > { %1597 = vmatprep.subr.bf16.mxu1 %v1807_v1 }
 0x3bc   : > { %1598 = vmatpush3.bf16.msra.mxu1 %v1963_v9 }
 0x3bd   : > { %1599 = vmatprep.subr.bf16.mxu1 %v1807_v1 }
 0x3c0   : > { %1600 = vmatpush3.bf16.msra.mxu1 %v1973_v11 }
 0x3c1   : > { %1601 = vmatprep.subr.bf16.mxu1 %v1807_v1 }
 0x3c4   : > { %1602 = vmatpush3.bf16.msra.mxu1 %v1983_v13 }
 0x3c5   : > { %1603 = vmatprep.subr.bf16.mxu1 %v1807_v1 }
 0x3c8   : > { %1604 = vmatpush3.bf16.msra.mxu1 %v1997_v18 }
 0x3c9   : > { %1605 = vmatprep.subr.bf16.mxu1 %v1807_v1 }
 0x3cc   : > { %1606 = vmatpush3.bf16.msra.mxu1 %v2016_v22 }
 0x3cd   : > { %1509 = vmatprep.subr.bf16.mxu1 %v2113_v40 }
 0x482   : > { %v1031_v4 = vpop.f32.mrb[8].mxu1 }
 0x483   : > { %v1032_v5 = vadd.f32 %v1031_v4, %v2242_v20  ;;  %v1033_v7 = vpop.f32.mrb[9].mxu1 }
 0x484   : > { %v1034_v9 = vadd.f32 %v1033_v7, %v2244_v23  ;;  %v1035_v11 = vpop.f32.mrb[10].mxu1 }
 0x485   : > { %v1036_v17 = vadd.f32 %v1035_v11, %v2242_v20  ;;  %v1037_v13 = vpop.f32.mrb[11].mxu1  ;;  %v1040_v52 = vmax.f32 %v1032_v5, 0.0 }
 0x486   : > { %v1038_v27 = vadd.f32 %v1037_v13, %v2244_v23  ;;  %v1041_v54 = vmax.f32 %v1034_v9, 0.0 }
 0x487   : > { %v1042_v18 = vmax.f32 %v1036_v17, 0.0 }
 0x488   : > { %v1043_v1 = vmax.f32 %v1038_v27, 0.0 }
 0x489   : > { %v1044_v55 = vpack.c.bf16 %v1042_v18, %v1040_v52 }
 0x48a   : > { %v1045_v22 = vpack.c.bf16 %v1043_v1, %v1041_v54 }
 0x48c   : > { %1078 = vmatprep.mubr.bf16.mxu0 %v1045_v22 }
 0x48d   : > { %1079 = vmatmul.mubr.bf16.vlgmr.msra.gmra.mrb[12].mxu0 %v1044_v55 }
 0x48e   : > { %1139 = vmatpush1.bf16.msra.mxu0 %v2006_v19  ;;  %1170 = vmatprep.mubr.bf16.mxu0 %v1809_v39 }
 0x48f   : > { %1140 = vmatprep.subr.bf16.mxu0 %v2012_v21 }
 0x492   : > { %1141 = vmatpush1.bf16.msra.mxu0 %v2026_v25 }
 0x493   : > { %1142 = vmatprep.subr.bf16.mxu0 %v2032_v26 }
 0x496   : > { %1143 = vmatpush1.bf16.msra.mxu0 %v2044_v28 }
 0x497   : > { %1144 = vmatprep.subr.bf16.mxu0 %v2050_v29 }
 0x49a   : > { %1145 = vmatpush1.bf16.msra.mxu0 %v2056_v30 }
 0x49b   : > { %1146 = vmatprep.subr.bf16.mxu0 %v2062_v31 }
 0x49e   : > { %1147 = vmatpush1.bf16.msra.mxu0 %v2068_v32 }
 0x49f   : > { %1148 = vmatprep.subr.bf16.mxu0 %v2074_v33 }
 0x4a2   : > { %1149 = vmatpush1.bf16.msra.mxu0 %v2080_v34 }
 0x4a3   : > { %1150 = vmatprep.subr.bf16.mxu0 %v2087_v35 }
 0x4a6   : > { %1151 = vmatpush1.bf16.msra.mxu0 %v2092_v36 }
 0x4a7   : > { %1152 = vmatprep.subr.bf16.mxu0 %v2099_v37 }
 0x4aa   : > { %1153 = vmatpush1.bf16.msra.mxu0 %v2104_v38 }
 0x560   : > { %v1494_v19 = vpop.f32.mrb[12].mxu0 }
 0x561   : > { %v1495_v21 = vpop.f32.mrb[13].mxu0 }
 0x562   : > { %v1496_v25 = vadd.f32 %v1495_v21, %v1494_v19  ;;  %v1497_v26 = vpop.f32.mrb[14].mxu0 }
 0x563   : > { %v1498_v28 = vpop.f32.mrb[15].mxu0 }
 0x564   : > { %v1087_v29 = vadd.f32 %v1496_v25, %v994_v12  ;;  %v1499_v30 = vadd.f32 %v1498_v28, %v1497_v26 }
 0x566   : > { %v1088_v31 = vadd.f32 %v1499_v30, %v995_v16  ;;  %v1089_v32 = vadd.f32 %v2271_v56, %v1087_v29 }
 0x568   : > { %v1090_v33 = vadd.f32 %v2271_v56, %v1088_v31 }
 0x56a   : > { %v1091_v34 = vpack.c.bf16 %v1090_v33, %v1089_v32 }
 0x56c   : > { %1608 = vmatmul.mubr.bf16.vlgmr.msra.gmra.mrb[12].mxu1 %v1091_v34 }
 0x56d   : > { %1510 = vmatpush3.bf16.msra.mxu1 %v2118_v41 }
 0x56e   : > { %1511 = vmatprep.subr.bf16.mxu1 %v2123_v42 }
 0x571   : > { %1512 = vmatpush3.bf16.msra.mxu1 %v2130_v43 }
 0x572   : > { %1513 = vmatprep.subr.bf16.mxu1 %v2136_v44 }
 0x575   : > { %1514 = vmatpush3.bf16.msra.mxu1 %v2142_v45 }
 0x576   : > { %1515 = vmatprep.subr.bf16.mxu1 %v2148_v46 }
 0x579   : > { %1516 = vmatpush3.bf16.msra.mxu1 %v2154_v47 }
 0x57a   : > { %1517 = vmatprep.subr.bf16.mxu1 %v2160_v48 }
 0x57d   : > { %1518 = vmatpush3.bf16.msra.mxu1 %v2166_v49 }
 0x57e   : > { %1519 = vmatprep.subr.bf16.mxu1 %v2172_v50 }
 0x581   : > { %1520 = vmatpush3.bf16.msra.mxu1 %v2211_v0 }
 0x582   : > { %1521 = vmatprep.subr.bf16.mxu1 %v2217_v2 }
 0x585   : > { %1522 = vmatpush3.bf16.msra.mxu1 %v2222_v3 }
 0x586   : > { %1523 = vmatprep.subr.bf16.mxu1 %v2229_v6 }
 0x589   : > { %1524 = vmatpush3.bf16.msra.mxu1 %v2234_v8 }
 0x63f   : > { %v1126_v35 = vpop.f32.mrb[12].mxu1 }
 0x640   : > { %v1133_v36 = vadd.f32 %v1126_v35, %v1089_v32  ;;  %v1609_v37 = vpop.f32.mrb[13].mxu1 }
 0x641   : > { %v1129_v38 = vpop.f32.mrb[14].mxu1 }
 0x642   : > { %v1135_v39 = vadd.f32 %v1133_v36, %v2176_v51  ;;  %v1134_v40 = vadd.f32 %v1129_v38, %v1090_v33  ;;  %v1610_v41 = vpop.f32.mrb[15].mxu1 }
 0x644   : > { %v1136_v42 = vadd.f32 %v1134_v40, %v2178_v53 }
 0x646   : > { %v1137_v43 = vpack.c.bf16 %v1136_v42, %v1135_v39 }
 0x648   : > { %1171 = vmatmul.mubr.bf16.vlgmr.msra.gmra.mrb[16].mxu0 %v1137_v43 }
 0x71b   : > { %v1172_v44 = vpop.f32.mrb[16].mxu0 }
 0x71c   : > { %v1173_v45 = vadd.f32 %v1172_v44, %v2242_v20  ;;  %v1174_v46 = vpop.f32.mrb[17].mxu0 }
 0x71d   : > { %v1175_v47 = vadd.f32 %v1174_v46, %v2244_v23  ;;  %v1176_v48 = vpop.f32.mrb[18].mxu0 }
 0x71e   : > { %v1177_v49 = vadd.f32 %v1176_v48, %v2242_v20  ;;  %v1178_v50 = vpop.f32.mrb[19].mxu0  ;;  %v1181_v51 = vmax.f32 %v1173_v45, 0.0 }
 0x71f   : > { %v1179_v0 = vadd.f32 %v1178_v50, %v2244_v23  ;;  %v1182_v3 = vmax.f32 %v1175_v47, 0.0 }
 0x720   : > { %v1183_v2 = vmax.f32 %v1177_v49, 0.0 }
 0x721   : > { %v1184_v6 = vmax.f32 %v1179_v0, 0.0 }
 0x722   : > { %v1185_v53 = vpack.c.bf16 %v1183_v2, %v1181_v51 }
 0x723   : > { %v1186_v8 = vpack.c.bf16 %v1184_v6, %v1182_v3 }
 0x725   : > { %1219 = vmatprep.mubr.bf16.mxu1 %v1186_v8 }
 0x726   : > { %1220 = vmatmul.mubr.bf16.vlgmr.msra.gmra.mrb[16].mxu1 %v1185_v53 }
 0x7f9   : > { %v1525_v57 = vpop.f32.mrb[16].mxu1 }
 0x7fa   : > { %v1526_v58 = vpop.f32.mrb[17].mxu1 }
 0x7fb   : > { %v1527_v60 = vadd.f32 %v1526_v58, %v1525_v57  ;;  %v1528_v61 = vpop.f32.mrb[18].mxu1 }
 0x7fc   : > { %v1529_v59 = vpop.f32.mrb[19].mxu1 }
 0x7fd   : > { %v1228_v20 = vadd.f32 %v1527_v60, %v1135_v39  ;;  %v1530_v23 = vadd.f32 %v1529_v59, %v1528_v61 }
 0x7ff   : > { %v1230_v62 = vadd.f32 %v2271_v56, %v1228_v20  ;;  %v1229_v63 = vadd.f32 %v1530_v23, %v1136_v42 }
 0x801   : > { %1232 = vst [vmem:[%s364_s11] sm:$0xff] %v1230_v62  ;;  %v1231_v10 = vadd.f32 %v2271_v56, %v1229_v63 }
 0x803   : > { %1233 = vst [vmem:[%s364_s11 + $0x8] sm:$0xff] %v1231_v10 }
 0x804   : > { %1740 = shalt.err (!%p1737_p5)
}
 0x805   : > { %s1741_s21 = scalar_lea.hbm %s2363_s14, 256  ;;  %s1745_s26 = scalar_lea.hbm %s2420_s8, 512 }
 0x806   : > { %p1742_p6 = scmp.ne.s32.totalorder %s2363_s14, %s1741_s21  ;;  %p1746_p10 = scmp.lt.u32.totalorder %s2363_s14, %s2420_s8 }
 0x807   : > { %p1747_p11 = scmp.lt.u32.totalorder %s1745_s26, %s1741_s21  ;;  %p1749_p13 = scmp.lt.u32.totalorder %s1741_s21, %s2363_s14 }
 0x808   : > { %p1743_p7 = pnand %p1742_p6, %p1898_p4 }
 0x809   : > { %p1748_p12 = por %p1747_p11, %p1746_p10 }
 0x80a   : > { %p1744_p9 = pneg %p1743_p7 }
 0x80b   : > { %p1750_p0 = por %p1749_p13, %p1748_p12 }
 0x80d   : > { %p1751_p1 = pnand %p1750_p0, %p1744_p9 }
 0x80f   : > { %1754 = shalt.err (!%p1751_p1)
}
 0x810   : > { %s1811_s30 = smov 128   ;;  %s1812_s23 = smov 8  }
 0x811   : > { %1611 = dma.vmem_to_hbm [thread:$0]  (%p1898_p4), %s2358_s24, 256, %s2363_s14, %s2366_s19, %s1811_s30, %s1811_s30, %s1812_s23  }
 0x812 PF: > { %p1617_p2 = scmp.ge.s32.totalorder %s1805_s10, 2  ;;  %s1265_s25 = sand.u32 1, %s1785_s27  }
 0x813   : > { %s1266_s20 = scalar_lea.sflag [#allocation3], %s1265_s25 }
 0x814   : > { %p1614_p3 = pnand %p1617_p2, %p1905_p8 }
 0x816   : > { %1780 = dma.done.wait (!%p1614_p3), %s1266_s20, 256  }
 0x817   : > { %1782 = vsyncadd (!%p1614_p3), %s1266_s20, 4294967040  ;;  %s21_s10 = sadd.s32 1, %s1805_s10   ;;  %s2423_s27 = smov %s1789_s28 }
 0x818   : > { %p18_p5 = scmp.ge.s32.totalorder %s21_s10, 4   ;;  %s2424_s28 = smov %s1793_s29 }
 0x819   : > { %s2425_s29 = smov %s1911_s18  ;;  %s2426_s30 = smov %s1801_s9 }
 0x81a   : > { %s2427_s9 = smov %s2429_s13  ;;  %20 = sbr.rel (!%p18_p5) target bundleno = 4 (0x4), region = 93 }
 0x821   :  { %1271 = vsyncpa [#allocation3], 1 }
 0x822   :  { %1273 = vsyncpa [#allocation3 + $0x1], 1 }

// kernel: _galerkin_decoder_impl.2
= control target key start
LH: loop header
LB: loop body
LE: loop exit
PB: predicated region body
PF: predicated region fallthrough
CT: control target
= control target key end

     0   :  { %s1928_s30 = smov 0   ;;  %s1930_s10 = smov 0   ;;  %s2121_s0 = inlined_call_operand.vmem [shape: f32[2,32,128], index: 0, kind: input, shape index: {}]   ;;  %s2122_s1 = inlined_call_operand.vmem [shape: bf16[128,128], index: 1, kind: input, shape index: {}]   ;;  %s2123_s2 = inlined_call_operand.vmem [shape: bf16[128,128], index: 2, kind: input, shape index: {}]   ;;  %s2124_s3 = inlined_call_operand.vmem [shape: f32[1,128], index: 3, kind: input, shape index: {}]   ;;  %s2125_s4 = inlined_call_operand.vmem [shape: f32[1,128], index: 4, kind: input, shape index: {}]   ;;  %s2126_s5 = inlined_call_operand.vmem [shape: f32[1,128], index: 5, kind: input, shape index: {}]   ;;  %s2127_s6 = inlined_call_operand.vmem [shape: f32[1,128], index: 6, kind: input, shape index: {}]   ;;  %s2128_s7 = inlined_call_operand.vmem [shape: bf16[128,128], index: 7, kind: input, shape index: {}]   ;;  %s2129_s8 = inlined_call_operand.vmem [shape: bf16[128,128], index: 8, kind: input, shape index: {}]   ;;  %s2130_s9 = inlined_call_operand.vmem [shape: bf16[2,128,128], index: 9, kind: output, shape index: {}]  }
   0x1   :  { %s1932_s11 = smov 0  }
   0x2 LB: > { %s31_s12 = sadd.s32 1, %s1872_s10  ;;  %p1463_p0 = scmp.ge.s32.totalorder %s1876_s11, 1  ;;  %s1876_s11 = sphi %s1932_s11, %s19_s11   ;;  %s1872_s10 = sphi %s1930_s10, %s2132_s10   ;;  %s1868_s30 = sphi %s1928_s30, %s2131_s30  }
   0x3   : > { %p33_p1 = scmp.ge.s32.totalorder %s31_s12, 2  ;;  %p306_p2 = scmp.lt.s32.totalorder %s1876_s11, 3 }
   0x5   : > { %s2134_s12 = smov (%p33_p1, %s31_s12), 0  ;;  %p307_p3 = pnand %p1463_p0, %p306_p2 }
   0x6   : > { %v1806_v0 = vld [vmem:[%s2122_s1] sm:$0xff] (!%p307_p3)   ;;  %p347_p4 = scmp.lt.s32.totalorder (!%p307_p3), %s1868_s30, 1  ;;  %v1807_v1 = vld [vmem:[%s2122_s1 + $0x8] sm:$0xff] (!%p307_p3)   ;;  %v1809_v3 = vld [vmem:[%s2122_s1 + $0x10] sm:$0xff] (!%p307_p3)   ;;  %vm783_vm0 = vcmask (!%p307_p3), 261120  }
   0x7   : > { %310 = sbr.rel (%p307_p3) target bundleno = 1387 (0x56b), region = 56  ;;  %1657 = vmatprep.subr.bf16.mxu0 (!%p307_p3), %v1806_v0  ;;  %v1808_v2 = vld [vmem:[%s2123_s2] sm:$0xff] (!%p307_p3)   ;;  %v1810_v4 = vld [vmem:[%s2123_s2 + $0x8] sm:$0xff] (!%p307_p3)   ;;  %v1812_v5 = vld [vmem:[%s2123_s2 + $0x10] sm:$0xff] (!%p307_p3)  }
   0x8   : > { %1658 = vmatpush3.bf16.msra.mxu0 (!%p307_p3), %v1806_v0  ;;  %1677 = vmatprep.subr.bf16.mxu1 (!%p307_p3), %v1808_v2  ;;  %v1811_v6 = vld [vmem:[%s2122_s1 + $0x18] sm:$0xff] (!%p307_p3)   ;;  %v1813_v8 = vld [vmem:[%s2122_s1 + $0x20] sm:$0xff] (!%p307_p3)   ;;  %v1815_v12 = vld [vmem:[%s2122_s1 + $0x28] sm:$0xff] (!%p307_p3)  }
   0x9   : > { %1659 = vmatprep.subr.bf16.mxu0 (!%p307_p3), %v1807_v1  ;;  %1678 = vmatpush3.bf16.msra.mxu1 (!%p307_p3), %v1808_v2  ;;  %v1814_v7 = vld [vmem:[%s2123_s2 + $0x18] sm:$0xff] (!%p307_p3)   ;;  %v1816_v9 = vld [vmem:[%s2123_s2 + $0x20] sm:$0xff] (!%p307_p3)   ;;  %v1818_v14 = vld [vmem:[%s2123_s2 + $0x28] sm:$0xff] (!%p307_p3)  }
   0xa   : > { %1679 = vmatprep.subr.bf16.mxu1 (!%p307_p3), %v1810_v4  ;;  %v1817_v15 = vld [vmem:[%s2122_s1 + $0x30] sm:$0xff] (!%p307_p3)   ;;  %v1819_v17 = vld [vmem:[%s2122_s1 + $0x38] sm:$0xff] (!%p307_p3)  }
   0xb   : > { %v1820_v16 = vld [vmem:[%s2123_s2 + $0x30] sm:$0xff] (!%p307_p3)   ;;  %v1821_v18 = vld [vmem:[%s2123_s2 + $0x38] sm:$0xff] (!%p307_p3)  }
   0xc   : > { %1660 = vmatpush3.bf16.msra.mxu0 (!%p307_p3), %v1807_v1 }
   0xd   : > { %1661 = vmatprep.subr.bf16.mxu0 (!%p307_p3), %v1809_v3  ;;  %1680 = vmatpush3.bf16.msra.mxu1 (!%p307_p3), %v1810_v4 }
   0xe   : > { %s2136_s30 = smov (!%p347_p4, %s1868_s30), 1  ;;  %1681 = vmatprep.subr.bf16.mxu1 %v1812_v5 }
   0xf   : > { %s1530_s27 = sshll.u32 %s2136_s30, 5  ;;  %s1531_s21 = sshll.u32 %s2136_s30, 6 }
  0x10   : > { %1662 = vmatpush3.bf16.msra.mxu0 %v1809_v3  ;;  %s354_s17 = scalar_lea.vmem %s2121_s0, %s1530_s27  ;;  %s360_s24 = scalar_lea.vmem %s2130_s9, %s1531_s21 }
  0x11   : > { %1663 = vmatprep.subr.bf16.mxu0 %v1811_v6  ;;  %1682 = vmatpush3.bf16.msra.mxu1 %v1812_v5  ;;  %v382_v10 = vld [vmem:[%s354_s17] sm:$0xff]  ;;  %v383_v11 = vld [vmem:[%s354_s17 + $0x8] sm:$0xff]  ;;  %v384_v19 = vld [vmem:[%s354_s17 + $0x10] sm:$0xff] }
  0x12   : > { %1683 = vmatprep.subr.bf16.mxu1 %v1814_v7  ;;  %v386_v13 = vpack.c.bf16 %v383_v11, %v382_v10  ;;  %v385_v20 = vld [vmem:[%s354_s17 + $0x18] sm:$0xff] }
  0x13   : > { %v387_v21 = vpack.c.bf16 %v385_v20, %v384_v19 }
  0x14   : > { %1664 = vmatpush3.bf16.msra.mxu0 %v1811_v6  ;;  %1673 = vmatprep.mubr.bf16.mxu0 %v386_v13 }
  0x15   : > { %1665 = vmatprep.subr.bf16.mxu0 %v1813_v8  ;;  %1684 = vmatpush3.bf16.msra.mxu1 %v1814_v7 }
  0x16   : > { %1685 = vmatprep.subr.bf16.mxu1 %v1816_v9  ;;  %1693 = vmatprep.mubr.bf16.mxu1 %v386_v13 }
  0x18   : > { %1666 = vmatpush3.bf16.msra.mxu0 %v1813_v8 }
  0x19   : > { %1667 = vmatprep.subr.bf16.mxu0 %v1815_v12  ;;  %1686 = vmatpush3.bf16.msra.mxu1 %v1816_v9 }
  0x1a   : > { %1687 = vmatprep.subr.bf16.mxu1 %v1818_v14 }
  0x1c   : > { %1668 = vmatpush3.bf16.msra.mxu0 %v1815_v12 }
  0x1d   : > { %1669 = vmatprep.subr.bf16.mxu0 %v1817_v15  ;;  %1688 = vmatpush3.bf16.msra.mxu1 %v1818_v14 }
  0x1e   : > { %1689 = vmatprep.subr.bf16.mxu1 %v1820_v16 }
  0x20   : > { %1670 = vmatpush3.bf16.msra.mxu0 %v1817_v15 }
  0x21   : > { %1671 = vmatprep.subr.bf16.mxu0 %v1819_v17  ;;  %1690 = vmatpush3.bf16.msra.mxu1 %v1820_v16 }
  0x22   : > { %1691 = vmatprep.subr.bf16.mxu1 %v1821_v18 }
  0x24   : > { %1672 = vmatpush3.bf16.msra.mxu0 %v1819_v17 }
  0x25   : > { %1692 = vmatpush3.bf16.msra.mxu1 %v1821_v18 }
  0x27   : > { %1674 = vmatmul.mubr.bf16.vlgmr.msra.gmra.mrb[0].mxu0 %v387_v21 }
  0x28   : > { %1694 = vmatmul.mubr.bf16.vlgmr.msra.gmra.mrb[0].mxu1 %v387_v21 }
  0xfa   : > { %v1675_v22 = vpop.f32.mrb[0].mxu0 }
  0xfb   : > { %507 = vadd.xlane.f32.xlu1 %v1675_v22  ;;  %v486_v23 = vpop.f32.mrb[1].mxu0  ;;  %v1695_v25 = vpop.f32.mrb[0].mxu1 }
  0xfc   : > { %503 = vadd.xlane.f32.xlu0 %v486_v23  ;;  %v1676_v24 = vpop.f32.mrb[2].mxu0  ;;  %v666_v27 = vpop.f32.mrb[1].mxu1 }
  0xfd   : > { %v489_v26 = vpop.f32.mrb[3].mxu0  ;;  %v1696_v28 = vpop.f32.mrb[2].mxu1 }
  0xfe   : > { %v669_v29 = vpop.f32.mrb[3].mxu1 }
  0xff   : > { %509 = vadd.xlane.f32.xlu1 %v1676_v24 }
 0x100   : > { %505 = vadd.xlane.f32.xlu0 %v489_v26 }
 0x103   : > { %685 = vadd.xlane.f32.xlu1 %v669_v29 }
 0x104   : > { %683 = vadd.xlane.f32.xlu0 %v666_v27 }
 0x107   : > { %689 = vadd.xlane.f32.xlu1 %v1696_v28 }
 0x108   : > { %687 = vadd.xlane.f32.xlu0 %v1695_v25 }
 0x188   : > { %v508_v30 = vpop.xlane.xlu1 %507 }
 0x189   : > { %v504_v31 = vpop.xlane.xlu0 %503  ;;  %v514_v32 = vmul.f32 0.0078125, %v508_v30 }
 0x18a   : > { %v512_v33 = vmul.f32 0.0078125, %v504_v31 }
 0x18b   : > { %v2002_v38 = vsub.f32 %v1675_v22, %v514_v32 }
 0x18c   : > { %v2000_v34 = vsub.f32 %v486_v23, %v512_v33  ;;  %v510_v35 = vpop.xlane.xlu1 %509  ;;  %v1476_v23 = vld [vmem:[%s2124_s3] ss:$0 sm:$0xff] }
 0x18d   : > { %v515_v36 = vmul.f32 0.0078125, %v510_v35  ;;  %v506_v37 = vpop.xlane.xlu0 %505  ;;  %v522_v47 = vmul.f32 %v2002_v38, %v2002_v38 }
 0x18e   : > { %v513_v39 = vmul.f32 0.0078125, %v506_v37  ;;  %v520_v40 = vmul.f32 %v2000_v34, %v2000_v34 }
 0x18f   : > { %v2008_v43 = vsub.f32 %v1676_v24, %v515_v36 }
 0x190   : > { %v2006_v41 = vsub.f32 %v489_v26, %v513_v39  ;;  %v686_v42 = vpop.xlane.xlu1 %685  ;;  %524 = vadd.xlane.f32.xlu0 %v520_v40  ;;  %v1486_v39 = vld [vmem:[%s2126_s5] ss:$0 sm:$0xff] }
 0x191   : > { %v684_v44 = vpop.xlane.xlu0 %683  ;;  %v692_v45 = vmul.f32 0.0078125, %v686_v42  ;;  %v523_v52 = vmul.f32 %v2008_v43, %v2008_v43 }
 0x192   : > { %v691_v46 = vmul.f32 0.0078125, %v684_v44  ;;  %v521_v48 = vmul.f32 %v2006_v41, %v2006_v41 }
 0x193   : > { %v2018_v53 = vsub.f32 %v669_v29, %v692_v45  ;;  %v1477_v29 = vld [vmem:[%s2125_s4] ss:$0 sm:$0xff] }
 0x194   : > { %v2014_v49 = vsub.f32 %v666_v27, %v691_v46  ;;  %v690_v50 = vpop.xlane.xlu1 %689  ;;  %528 = vadd.xlane.f32.xlu0 %v522_v47  ;;  %526 = vadd.xlane.f32.xlu1 %v521_v48 }
 0x195   : > { %v688_v51 = vpop.xlane.xlu0 %687  ;;  %v694_v54 = vmul.f32 0.0078125, %v690_v50  ;;  %v700_v59 = vmul.f32 %v2018_v53, %v2018_v53 }
 0x196   : > { %v693_v55 = vmul.f32 0.0078125, %v688_v51  ;;  %v699_v56 = vmul.f32 %v2014_v49, %v2014_v49 }
 0x197   : > { %v2024_v58 = vsub.f32 %v1696_v28, %v694_v54 }
 0x198   : > { %v2022_v57 = vsub.f32 %v1695_v25, %v693_v55  ;;  %530 = vadd.xlane.f32.xlu1 %v523_v52  ;;  %703 = vadd.xlane.f32.xlu0 %v699_v56 }
 0x199   : > { %v702_v61 = vmul.f32 %v2024_v58, %v2024_v58 }
 0x19a   : > { %v701_v60 = vmul.f32 %v2022_v57, %v2022_v57 }
 0x19c   : > { %705 = vadd.xlane.f32.xlu1 %v700_v59  ;;  %707 = vadd.xlane.f32.xlu0 %v701_v60 }
 0x1a0   : > { %709 = vadd.xlane.f32.xlu1 %v702_v61 }
 0x21d   : > { %v525_v62 = vpop.xlane.xlu0 %524 }
 0x21e   : > { %v532_v63 = vmul.f32 0.0078125, %v525_v62 }
 0x220   : > { %v536_v0 = vadd.f32 1e-05, %v532_v63 }
 0x221   : > { %v527_v1 = vpop.xlane.xlu1 %526  ;;  %v529_v2 = vpop.xlane.xlu0 %528 }
 0x222   : > { %1838 = vrsqrt.f32 %v536_v0  ;;  %v533_v3 = vmul.f32 0.0078125, %v527_v1  ;;  %v534_v4 = vmul.f32 0.0078125, %v529_v2 }
 0x224   : > { %v537_v5 = vadd.f32 1e-05, %v533_v3  ;;  %v538_v6 = vadd.f32 1e-05, %v534_v4 }
 0x225   : > { %v531_v7 = vpop.xlane.xlu1 %530  ;;  %v704_v8 = vpop.xlane.xlu0 %703 }
 0x226   : > { %1840 = vrsqrt.f32 %v537_v5  ;;  %v535_v9 = vmul.f32 0.0078125, %v531_v7  ;;  %v711_v10 = vmul.f32 0.0078125, %v704_v8  ;;  %v1830_v7 = vld [vmem:[%s2129_s8] sm:$0xff]   ;;  %v1831_v8 = vld [vmem:[%s2129_s8 + $0x8] sm:$0xff]  }
 0x227   : > { %1842 = vrsqrt.f32 %v538_v6  ;;  %v1822_v6 = vld [vmem:[%s2128_s7] sm:$0xff]  }
 0x228   : > { %v539_v11 = vadd.f32 1e-05, %v535_v9  ;;  %v715_v12 = vadd.f32 1e-05, %v711_v10  ;;  %1733 = vmatprep.mubr.bf16.mxu1 %v1822_v6  ;;  %v1832_v9 = vld [vmem:[%s2129_s8 + $0x10] sm:$0xff]   ;;  %v1833_v10 = vld [vmem:[%s2129_s8 + $0x18] sm:$0xff]  }
 0x229   : > { %v706_v13 = vpop.xlane.xlu1 %705  ;;  %v708_v14 = vpop.xlane.xlu0 %707 }
 0x22a   : > { %1844 = vrsqrt.f32 %v539_v11  ;;  %v712_v15 = vmul.f32 0.0078125, %v706_v13  ;;  %v713_v16 = vmul.f32 0.0078125, %v708_v14  ;;  %v1834_v11 = vld [vmem:[%s2129_s8 + $0x20] sm:$0xff]   ;;  %v1836_v13 = vld [vmem:[%s2129_s8 + $0x30] sm:$0xff]  }
 0x22b   : > { %1846 = vrsqrt.f32 %v715_v12  ;;  %v1835_v12 = vld [vmem:[%s2129_s8 + $0x28] sm:$0xff]  }
 0x22c   : > { %v1839_v17 = vpop.eup %1838  ;;  %v716_v18 = vadd.f32 1e-05, %v712_v15  ;;  %v717_v19 = vadd.f32 1e-05, %v713_v16 }
 0x22d   : > { %v710_v20 = vpop.xlane.xlu1 %709  ;;  %v544_v21 = vmul.f32 %v1839_v17, %v2000_v34 }
 0x22e   : > { %1848 = vrsqrt.f32 %v716_v18  ;;  %v714_v22 = vmul.f32 0.0078125, %v710_v20 }
 0x22f   : > { %1850 = vrsqrt.f32 %v717_v19  ;;  %v554_v28 = vmul.f32 %v1476_v23, %v544_v21 }
 0x230   : > { %v1841_v24 = vpop.eup %1840  ;;  %v718_v25 = vadd.f32 1e-05, %v714_v22 }
 0x231   : > { %v1843_v26 = vpop.eup %1842  ;;  %v545_v27 = vmul.f32 %v1841_v24, %v2006_v41  ;;  %v564_v34 = vadd.f32 %v1477_v29, %v554_v28 }
 0x232   : > { %1852 = vrsqrt.f32 %v718_v25  ;;  %v546_v30 = vmul.f32 %v1843_v26, %v2002_v38 }
 0x233   : > { %v555_v31 = vmul.f32 %v1476_v23, %v545_v27 }
 0x234   : > { %v1845_v32 = vpop.eup %1844  ;;  %v556_v37 = vmul.f32 %v1476_v23, %v546_v30 }
 0x235   : > { %v1847_v33 = vpop.eup %1846  ;;  %v565_v35 = vadd.f32 %v1477_v29, %v555_v31  ;;  %v547_v36 = vmul.f32 %v1845_v32, %v2008_v43  ;;  %v1487_v43 = vld [vmem:[%s2127_s6] ss:$0 sm:$0xff] }
 0x236   : > { %v723_v40 = vmul.f32 %v1847_v33, %v2014_v49  ;;  %v566_v38 = vadd.f32 %v1477_v29, %v556_v37 }
 0x237   : > { %v763_v41 = vpack.c.bf16 %v565_v35, %v564_v34  ;;  %v557_v42 = vmul.f32 %v1476_v23, %v547_v36 }
 0x238   : > { %v1849_v44 = vpop.eup %1848  ;;  %v733_v48 = vmul.f32 %v1486_v39, %v723_v40 }
 0x239   : > { %v1851_v45 = vpop.eup %1850  ;;  %767 = vxpose.xlu0.c.b16.start [1/2] (short) %v763_v41, 128  ;;  %v567_v46 = vadd.f32 %v1477_v29, %v557_v42  ;;  %v724_v47 = vmul.f32 %v1849_v44, %v2018_v53 }
 0x23a   : > { %v725_v50 = vmul.f32 %v1851_v45, %v2022_v57  ;;  %v743_v49 = vadd.f32 %v1487_v43, %v733_v48 }
 0x23b   : > { %v764_v51 = vpack.c.bf16 %v567_v46, %v566_v38  ;;  %v734_v52 = vmul.f32 %v1486_v39, %v724_v47 }
 0x23c   : > { %v1853_v54 = vpop.eup %1852  ;;  %v735_v59 = vmul.f32 %v1486_v39, %v725_v50 }
 0x23d   : > { %768 = vxpose.xlu0.c.b16.end [2/2] (short) %v764_v51, 128  ;;  %v744_v55 = vadd.f32 %v1487_v43, %v734_v52  ;;  %v726_v56 = vmul.f32 %v1853_v54, %v2024_v58 }
 0x23e   : > { %v745_v53 = vadd.f32 %v1487_v43, %v735_v59  ;;  %v1825_v59 = vld [vmem:[%s2128_s7 + $0x18] sm:$0xff]  }
 0x23f   : > { %v765_v60 = vpack.c.bf16 %v744_v55, %v743_v49  ;;  %v736_v61 = vmul.f32 %v1486_v39, %v726_v56  ;;  %v1823_v55 = vld [vmem:[%s2128_s7 + $0x8] sm:$0xff]   ;;  %v1824_v56 = vld [vmem:[%s2128_s7 + $0x10] sm:$0xff]  }
 0x241   : > { %1697 = vmatprep.subr.bf16.mxu0 %v765_v60  ;;  %v746_v62 = vadd.f32 %v1487_v43, %v736_v61  ;;  %v1827_v61 = vld [vmem:[%s2128_s7 + $0x28] sm:$0xff]  }
 0x242   : > { %1698 = vmatpush3.bf16.msra.mxu0 %v765_v60  ;;  %v1826_v60 = vld [vmem:[%s2128_s7 + $0x20] sm:$0xff]  }
 0x243   : > { %v766_v63 = vpack.c.bf16 %v746_v62, %v745_v53  ;;  %v1828_v53 = vld [vmem:[%s2128_s7 + $0x30] sm:$0xff]   ;;  %v1829_v62 = vld [vmem:[%s2128_s7 + $0x38] sm:$0xff]  }
 0x245   : > { %1699 = vmatprep.subr.bf16.mxu0 %v766_v63 }
 0x246   : > { %1700 = vmatpush3.bf16.msra.mxu0 %v766_v63  ;;  %v1837_v63 = vld [vmem:[%s2129_s8 + $0x38] sm:$0xff]  }
 0x247   : > { %1749 = vmatprep.subr.bf16.mxu0 %v1830_v7 }
 0x29f   : > { %v775_v57 = vpop.trf.xlu0 }
 0x2a0   : > { %1701 = vmatprep.mubr.msk.bf16.mxu0 %vm783_vm0, %v775_v57 }
 0x2a3   : > { %v776_v0 = vpop.trf.xlu0 }
 0x2a4   : > { %1702 = vmatmul.mubr.msk.bf16.vlgmr.msra.gmra.mrb[4].mxu0 %vm783_vm0, %v776_v0 }
 0x2a5   : > { %1750 = vmatpush3.bf16.msra.mxu0 %v1830_v7 }
 0x2a6   : > { %1751 = vmatprep.subr.bf16.mxu0 %v1831_v8 }
 0x2a7   : > { %v777_v1 = vpop.trf.xlu0 }
 0x2a8   : > { %1705 = vmatprep.mubr.msk.bf16.mxu0 %vm783_vm0, %v777_v1 }
 0x2a9   : > { %1752 = vmatpush3.bf16.msra.mxu0 %v1831_v8 }
 0x2aa   : > { %1753 = vmatprep.subr.bf16.mxu0 %v1832_v9 }
 0x2ab   : > { %v778_v58 = vpop.trf.xlu0 }
 0x2ac   : > { %1706 = vmatmul.mubr.msk.bf16.gmra.mrb[8].mxu0 %vm783_vm0, %v778_v58 }
 0x2ad   : > { %1754 = vmatpush3.bf16.msra.mxu0 %v1832_v9 }
 0x2ae   : > { %1755 = vmatprep.subr.bf16.mxu0 %v1833_v10 }
 0x2af   : > { %v779_v2 = vpop.trf.xlu0 }
 0x2b0   : > { %1709 = vmatprep.mubr.msk.bf16.mxu0 %vm783_vm0, %v779_v2 }
 0x2b1   : > { %1756 = vmatpush3.bf16.msra.mxu0 %v1833_v10 }
 0x2b2   : > { %1757 = vmatprep.subr.bf16.mxu0 %v1834_v11 }
 0x2b3   : > { %v780_v3 = vpop.trf.xlu0 }
 0x2b4   : > { %1710 = vmatmul.mubr.msk.bf16.gmra.mrb[12].mxu0 %vm783_vm0, %v780_v3 }
 0x2b5   : > { %1758 = vmatpush3.bf16.msra.mxu0 %v1834_v11 }
 0x2b6   : > { %1759 = vmatprep.subr.bf16.mxu0 %v1835_v12 }
 0x2b7   : > { %v781_v4 = vpop.trf.xlu0 }
 0x2b8   : > { %1713 = vmatprep.mubr.msk.bf16.mxu0 %vm783_vm0, %v781_v4 }
 0x2b9   : > { %1760 = vmatpush3.bf16.msra.mxu0 %v1835_v12 }
 0x2ba   : > { %1761 = vmatprep.subr.bf16.mxu0 %v1836_v13 }
 0x2bb   : > { %v782_v5 = vpop.trf.xlu0 }
 0x2bc   : > { %1714 = vmatmul.mubr.msk.bf16.gmra.mrb[16].mxu0 %vm783_vm0, %v782_v5 }
 0x2bd   : > { %1762 = vmatpush3.bf16.msra.mxu0 %v1836_v13 }
 0x2be   : > { %1763 = vmatprep.subr.bf16.mxu0 %v1837_v63 }
 0x2c1   : > { %1764 = vmatpush3.bf16.msra.mxu0 %v1837_v63 }
 0x377   : > { %v1703_v14 = vpop.f32.mrb[4].mxu0 }
 0x378   : > { %v842_v15 = vpop.f32.mrb[5].mxu0  ;;  %v958_v17 = vmul.f32 0.03125, %v1703_v14 }
 0x379   : > { %v1704_v16 = vpop.f32.mrb[6].mxu0  ;;  %v956_v20 = vmul.f32 0.03125, %v842_v15 }
 0x37a   : > { %v959_v18 = vmul.f32 0.03125, %v1704_v16  ;;  %v845_v19 = vpop.f32.mrb[7].mxu0 }
 0x37b   : > { %v957_v21 = vmul.f32 0.03125, %v845_v19 }
 0x37c   : > { %v973_v22 = vpack.c.bf16 %v959_v18, %v958_v17 }
 0x37d   : > { %v972_v23 = vpack.c.bf16 %v957_v21, %v956_v20 }
 0x37f   : > { %v1707_v24 = vpop.f32.mrb[8].mxu0  ;;  %1717 = vmatprep.subr.bf16.mxu1 %v972_v23 }
 0x380   : > { %v858_v25 = vpop.f32.mrb[9].mxu0  ;;  %1718 = vmatpush3.bf16.msra.mxu1 %v972_v23  ;;  %v962_v27 = vmul.f32 0.03125, %v1707_v24 }
 0x381   : > { %v1708_v26 = vpop.f32.mrb[10].mxu0  ;;  %1719 = vmatprep.subr.bf16.mxu1 %v973_v22  ;;  %v960_v30 = vmul.f32 0.03125, %v858_v25 }
 0x382   : > { %v963_v28 = vmul.f32 0.03125, %v1708_v26  ;;  %v861_v29 = vpop.f32.mrb[11].mxu0 }
 0x383   : > { %v961_v31 = vmul.f32 0.03125, %v861_v29 }
 0x384   : > { %v975_v32 = vpack.c.bf16 %v963_v28, %v962_v27  ;;  %1720 = vmatpush3.bf16.msra.mxu1 %v973_v22 }
 0x385   : > { %v974_v33 = vpack.c.bf16 %v961_v31, %v960_v30 }
 0x387   : > { %v1711_v34 = vpop.f32.mrb[12].mxu0  ;;  %1721 = vmatprep.subr.bf16.mxu1 %v974_v33 }
 0x388   : > { %v874_v35 = vpop.f32.mrb[13].mxu0  ;;  %1722 = vmatpush3.bf16.msra.mxu1 %v974_v33  ;;  %v966_v37 = vmul.f32 0.03125, %v1711_v34 }
 0x389   : > { %v1712_v36 = vpop.f32.mrb[14].mxu0  ;;  %1723 = vmatprep.subr.bf16.mxu1 %v975_v32  ;;  %v964_v41 = vmul.f32 0.03125, %v874_v35 }
 0x38a   : > { %v967_v39 = vmul.f32 0.03125, %v1712_v36  ;;  %v877_v40 = vpop.f32.mrb[15].mxu0 }
 0x38b   : > { %v965_v42 = vmul.f32 0.03125, %v877_v40 }
 0x38c   : > { %v977_v44 = vpack.c.bf16 %v967_v39, %v966_v37  ;;  %1724 = vmatpush3.bf16.msra.mxu1 %v975_v32 }
 0x38d   : > { %v976_v45 = vpack.c.bf16 %v965_v42, %v964_v41 }
 0x38f   : > { %v1715_v38 = vpop.f32.mrb[16].mxu0  ;;  %1725 = vmatprep.subr.bf16.mxu1 %v976_v45 }
 0x390   : > { %v890_v46 = vpop.f32.mrb[17].mxu0  ;;  %1726 = vmatpush3.bf16.msra.mxu1 %v976_v45  ;;  %v970_v48 = vmul.f32 0.03125, %v1715_v38 }
 0x391   : > { %v1716_v47 = vpop.f32.mrb[18].mxu0  ;;  %1727 = vmatprep.subr.bf16.mxu1 %v977_v44  ;;  %v968_v51 = vmul.f32 0.03125, %v890_v46 }
 0x392   : > { %v971_v43 = vmul.f32 0.03125, %v1716_v47  ;;  %v893_v50 = vpop.f32.mrb[19].mxu0 }
 0x393   : > { %v969_v52 = vmul.f32 0.03125, %v893_v50 }
 0x394   : > { %v979_v54 = vpack.c.bf16 %v971_v43, %v970_v48  ;;  %1728 = vmatpush3.bf16.msra.mxu1 %v977_v44 }
 0x395   : > { %v978_v49 = vpack.c.bf16 %v969_v52, %v968_v51 }
 0x397   : > { %1729 = vmatprep.subr.bf16.mxu1 %v978_v49 }
 0x398   : > { %1730 = vmatpush3.bf16.msra.mxu1 %v978_v49 }
 0x399   : > { %1731 = vmatprep.subr.bf16.mxu1 %v979_v54 }
 0x39c   : > { %1732 = vmatpush3.bf16.msra.mxu1 %v979_v54 }
 0x39f   : > { %1734 = vmatmul.mubr.bf16.vlgmr.msra.gmra.mrb[4].mxu1 %v1823_v55 }
 0x3a0   : > { %1737 = vmatprep.mubr.bf16.mxu1 %v1824_v56 }
 0x3a7   : > { %1738 = vmatmul.mubr.bf16.gmra.mrb[8].mxu1 %v1825_v59 }
 0x3a8   : > { %1741 = vmatprep.mubr.bf16.mxu1 %v1826_v60 }
 0x3af   : > { %1742 = vmatmul.mubr.bf16.gmra.mrb[12].mxu1 %v1827_v61 }
 0x3b0   : > { %1745 = vmatprep.mubr.bf16.mxu1 %v1828_v53 }
 0x3b7   : > { %1746 = vmatmul.mubr.bf16.gmra.mrb[16].mxu1 %v1829_v62 }
 0x472   : > { %v1735_v57 = vpop.f32.mrb[4].mxu1 }
 0x473   : > { %v1078_v0 = vpop.f32.mrb[5].mxu1 }
 0x474   : > { %v1736_v1 = vpop.f32.mrb[6].mxu1 }
 0x475   : > { %v1142_v58 = vpack.c.bf16 %v1736_v1, %v1735_v57  ;;  %v1081_v2 = vpop.f32.mrb[7].mxu1 }
 0x476   : > { %v1141_v3 = vpack.c.bf16 %v1081_v2, %v1078_v0 }
 0x478   : > { %1765 = vmatprep.mubr.bf16.mxu0 %v1141_v3 }
 0x479   : > { %1766 = vmatmul.mubr.bf16.vlgmr.msra.gmra.mrb[20].mxu0 %v1142_v58 }
 0x47a   : > { %v1739_v4 = vpop.f32.mrb[8].mxu1 }
 0x47b   : > { %v1094_v5 = vpop.f32.mrb[9].mxu1 }
 0x47c   : > { %v1740_v6 = vpop.f32.mrb[10].mxu1 }
 0x47d   : > { %v1144_v7 = vpack.c.bf16 %v1740_v6, %v1739_v4  ;;  %v1097_v8 = vpop.f32.mrb[11].mxu1 }
 0x47e   : > { %v1143_v9 = vpack.c.bf16 %v1097_v8, %v1094_v5 }
 0x480   : > { %1769 = vmatprep.mubr.bf16.mxu0 %v1143_v9 }
 0x481   : > { %1770 = vmatmul.mubr.bf16.gmra.mrb[24].mxu0 %v1144_v7 }
 0x482   : > { %v1743_v10 = vpop.f32.mrb[12].mxu1 }
 0x483   : > { %v1110_v11 = vpop.f32.mrb[13].mxu1 }
 0x484   : > { %v1744_v12 = vpop.f32.mrb[14].mxu1 }
 0x485   : > { %v1146_v13 = vpack.c.bf16 %v1744_v12, %v1743_v10  ;;  %v1113_v14 = vpop.f32.mrb[15].mxu1 }
 0x486   : > { %v1145_v15 = vpack.c.bf16 %v1113_v14, %v1110_v11 }
 0x488   : > { %1773 = vmatprep.mubr.bf16.mxu0 %v1145_v15 }
 0x489   : > { %1774 = vmatmul.mubr.bf16.gmra.mrb[28].mxu0 %v1146_v13 }
 0x48a   : > { %v1747_v16 = vpop.f32.mrb[16].mxu1 }
 0x48b   : > { %v1126_v17 = vpop.f32.mrb[17].mxu1 }
 0x48c   : > { %v1748_v18 = vpop.f32.mrb[18].mxu1 }
 0x48d   : > { %v1148_v19 = vpack.c.bf16 %v1748_v18, %v1747_v16  ;;  %v1129_v20 = vpop.f32.mrb[19].mxu1 }
 0x48e   : > { %v1147_v21 = vpack.c.bf16 %v1129_v20, %v1126_v17 }
 0x490   : > { %1777 = vmatprep.mubr.bf16.mxu0 %v1147_v21 }
 0x491   : > { %1778 = vmatmul.mubr.bf16.gmra.mrb[32].mxu0 %v1148_v19 }
 0x54c   : > { %v1767_v22 = vpop.f32.mrb[20].mxu0 }
 0x54d   : > { %v1247_v23 = vpop.f32.mrb[21].mxu0 }
 0x54e   : > { %v1768_v24 = vpop.f32.mrb[22].mxu0 }
 0x54f   : > { %v1556_v25 = vpack.c.bf16 %v1768_v24, %v1767_v22  ;;  %v1250_v26 = vpop.f32.mrb[23].mxu0 }
 0x550   : > { %v1551_v27 = vpack.c.bf16 %v1250_v26, %v1247_v23 }
 0x551   : > { %1588 = vst [vmem:[%s360_s24 + $0x8] sm:$0xff] %v1556_v25  }
 0x552   : > { %1552 = vst [vmem:[%s360_s24] sm:$0xff] %v1551_v27  }
 0x554   : > { %v1771_v28 = vpop.f32.mrb[24].mxu0 }
 0x555   : > { %v1263_v29 = vpop.f32.mrb[25].mxu0 }
 0x556   : > { %v1772_v30 = vpop.f32.mrb[26].mxu0 }
 0x557   : > { %v1566_v31 = vpack.c.bf16 %v1772_v30, %v1771_v28  ;;  %v1266_v32 = vpop.f32.mrb[27].mxu0 }
 0x558   : > { %v1561_v33 = vpack.c.bf16 %v1266_v32, %v1263_v29 }
 0x559   : > { %1590 = vst [vmem:[%s360_s24 + $0x18] sm:$0xff] %v1566_v31  }
 0x55a   : > { %1589 = vst [vmem:[%s360_s24 + $0x10] sm:$0xff] %v1561_v33  }
 0x55c   : > { %v1775_v34 = vpop.f32.mrb[28].mxu0 }
 0x55d   : > { %v1279_v35 = vpop.f32.mrb[29].mxu0 }
 0x55e   : > { %v1776_v36 = vpop.f32.mrb[30].mxu0 }
 0x55f   : > { %v1576_v37 = vpack.c.bf16 %v1776_v36, %v1775_v34  ;;  %v1282_v39 = vpop.f32.mrb[31].mxu0 }
 0x560   : > { %v1571_v40 = vpack.c.bf16 %v1282_v39, %v1279_v35 }
 0x561   : > { %1592 = vst [vmem:[%s360_s24 + $0x28] sm:$0xff] %v1576_v37  }
 0x562   : > { %1591 = vst [vmem:[%s360_s24 + $0x20] sm:$0xff] %v1571_v40  }
 0x564   : > { %v1779_v41 = vpop.f32.mrb[32].mxu0 }
 0x565   : > { %v1295_v42 = vpop.f32.mrb[33].mxu0 }
 0x566   : > { %v1780_v44 = vpop.f32.mrb[34].mxu0 }
 0x567   : > { %v1586_v45 = vpack.c.bf16 %v1780_v44, %v1779_v41  ;;  %v1298_v38 = vpop.f32.mrb[35].mxu0 }
 0x568   : > { %v1581_v46 = vpack.c.bf16 %v1298_v38, %v1295_v42 }
 0x569   : > { %1594 = vst [vmem:[%s360_s24 + $0x38] sm:$0xff] %v1586_v45  }
 0x56a   : > { %1593 = vst [vmem:[%s360_s24 + $0x30] sm:$0xff] %v1581_v46  }
 0x56b PF: > { %s19_s11 = sadd.s32 1, %s1876_s11   ;;  %s2131_s30 = smov %s1872_s10 }
 0x56c   : > { %p16_p5 = scmp.ge.s32.totalorder %s19_s11, 4   ;;  %s2132_s10 = smov %s2134_s12 }
 0x56e   :  { %18 = sbr.rel (!%p16_p5) target bundleno = 2 (0x2), region = 94 }

</bundles_post_ra>
